<compile_context>
chip_gen: v7x
topology: tpu7x:2x2x1
jax: 0.10.0
libtpu: 0.0.40
codegen_flags: <defaults>
</compile_context>

<pallas_src>
import functools
import math

import numpy as np
import jax
import jax.numpy as jnp
from jax.experimental import pallas as pl
from jax.experimental.pallas import tpu as pltpu


def _round_up(a: int, b: int) -> int:
    return ((a + b - 1) // b) * b


def _lane_pad(d: int) -> int:
    return _round_up(max(int(d), 1), 128)


# ---------------- kernels ----------------

def _mlp_kernel(dir_ref, x_ref, w1d_ref, w1x_ref, b1_ref, w2_ref, b2_ref,
                w3_ref, b3_ref, out_ref):
    # dir_ref: [tile_n, d_dir], x_ref: [tile_n, d_x]   (row-major batch tiles)
    # wK_ref : [in, out] (pre-transposed once in prepare_params)
    # bK_ref : [1, out] f32
    # out_ref: [tile_n, d_out]  (written straight into the [N, D_OUT] output)
    cdt = w2_ref.dtype
    # layer 1 == Linear over cat([dir, x], 1), with W1 statically split so the
    # concat never materializes.
    h = jnp.dot(dir_ref[...].astype(cdt), w1d_ref[...],
                preferred_element_type=jnp.float32)
    h = h + jnp.dot(x_ref[...].astype(cdt), w1x_ref[...],
                    preferred_element_type=jnp.float32)
    h = jnp.maximum(h + b1_ref[...], 0.0)
    h = jnp.dot(h.astype(cdt), w2_ref[...], preferred_element_type=jnp.float32)
    h = jnp.maximum(h + b2_ref[...], 0.0)
    o = jnp.dot(h.astype(cdt), w3_ref[...], preferred_element_type=jnp.float32)
    out_ref[...] = (o + b3_ref[...]).astype(out_ref.dtype)


def _mlp_kernel_single(x_ref, w1_ref, b1_ref, w2_ref, b2_ref,
                       w3_ref, b3_ref, out_ref):
    # append_sh=False path: the MLP consumes x alone.
    cdt = w2_ref.dtype
    h = jnp.dot(x_ref[...].astype(cdt), w1_ref[...],
                preferred_element_type=jnp.float32)
    h = jnp.maximum(h + b1_ref[...], 0.0)
    h = jnp.dot(h.astype(cdt), w2_ref[...], preferred_element_type=jnp.float32)
    h = jnp.maximum(h + b2_ref[...], 0.0)
    o = jnp.dot(h.astype(cdt), w3_ref[...], preferred_element_type=jnp.float32)
    out_ref[...] = (o + b3_ref[...]).astype(out_ref.dtype)


# ---------------- wrapper ----------------

def tcnn_model_forward(dir_, x, params, *, append_sh=True, tile_n=4096,
                       out_dtype=jnp.float32, core_parallel=False):
    """Pallas-backed TCNNModel.forward.

    dir_: [N, D_DIR] (ignored / may be None if append_sh=False), x: [N, D_X].
    params: dict from prepare_params() -- weights [in, out], biases [1, out].
    Returns [N, D_OUT] in out_dtype (f32 by default, matching PyTorch).
    Set core_parallel=True on v7x to shard the batch axis across both TCs.
    """
    n, d_x = x.shape
    d_dir = dir_.shape[1] if append_sh else 0
    hidden = params["w2"].shape[0]
    d_out = params["w3"].shape[1]
    assert params["w1"].shape[0] == d_dir + d_x

    # batch tile: multiple of 128, clamped to what the batch needs.
    tile_n = max(128, min(_round_up(int(tile_n), 128), _round_up(n, 128)))
    grid = (pl.cdiv(n, tile_n),)          # ragged last block -> masked stores

    def batch_spec(d):                    # tiled over batch, full feature dim
        return pl.BlockSpec((tile_n, d), lambda i: (i, 0))

    def full_spec(a):                     # tiny params, constant block index
        return pl.BlockSpec(a.shape, lambda i: (0, 0))   # -> no per-step DMA

    if append_sh:
        w1d = params["w1"][:d_dir]        # static split of W1 (tiny slices)
        w1x = params["w1"][d_dir:]
        w_args = (w1d, w1x, params["b1"], params["w2"], params["b2"],
                  params["w3"], params["b3"])
        args = (dir_, x) + w_args
        in_specs = ([batch_spec(d_dir), batch_spec(d_x)]
                    + [full_spec(a) for a in w_args])
        kernel = _mlp_kernel
    else:
        w_args = (params["w1"], params["b1"], params["w2"], params["b2"],
                  params["w3"], params["b3"])
        args = (x,) + w_args
        in_specs = [batch_spec(d_x)] + [full_spec(a) for a in w_args]
        kernel = _mlp_kernel_single

    # Raise the scoped-VMEM limit only when the tile needs it; cap at 48 MiB
    # so the budget also fits v7x's 64 MiB physical VMEM.
    blk = tile_n * (_lane_pad(d_x) * x.dtype.itemsize
                    + (_lane_pad(d_dir) * dir_.dtype.itemsize if append_sh else 0)
                    + _lane_pad(d_out) * np.dtype(out_dtype).itemsize)
    vmem_est = 2 * blk + 4 * tile_n * _lane_pad(hidden) * 4 + (2 << 20)
    vmem_limit = None if vmem_est <= (24 << 20) else int(min(vmem_est, 48 << 20))

    sem = (pltpu.CORE_PARALLEL,) if core_parallel else ("parallel",)

    return pl.pallas_call(
        kernel,
        out_shape=jax.ShapeDtypeStruct((n, d_out), out_dtype),
        grid_spec=pltpu.PrefetchScalarGridSpec(
            num_scalar_prefetch=0,
            grid=grid,
            in_specs=in_specs,
            out_specs=batch_spec(d_out),
        ),
        compiler_params=pltpu.CompilerParams(
            dimension_semantics=sem,
            vmem_limit_bytes=vmem_limit,
        ),
    )(*args)


# ---------------- parameters ----------------

def init_params(key, d_in, hidden, d_out):
    """PyTorch nn.Linear-style params, native layout: W [out, in], b [out]."""
    ks = jax.random.split(key, 6)

    def linear(kw, kb, fan_in, fan_out):
        bound = 1.0 / math.sqrt(fan_in)
        w = jax.random.uniform(kw, (fan_out, fan_in), jnp.float32, -bound, bound)
        b = jax.random.uniform(kb, (fan_out,), jnp.float32, -bound, bound)
        return w, b

    w1, b1 = linear(ks[0], ks[1], d_in, hidden)
    w2, b2 = linear(ks[2], ks[3], hidden, hidden)
    w3, b3 = linear(ks[4], ks[5], hidden, d_out)
    return dict(w1=w1, b1=b1, w2=w2, b2=b2, w3=w3, b3=b3)


def prepare_params(params, compute_dtype=jnp.bfloat16):
    """One-time layout/dtype conversion, hoisted out of the per-call path.

    Weights -> [in, out] in compute_dtype (bf16 default: best on all chips for
    this HBM-bound kernel, mandatory-ish on v5e); biases -> [1, out] f32.
    """
    def w(k): return params[k].T.astype(compute_dtype)
    def b(k): return params[k].reshape(1, -1).astype(jnp.float32)
    return dict(w1=w("w1"), b1=b("b1"), w2=w("w2"), b2=b("b2"),
                w3=w("w3"), b3=b("b3"))


def reference_forward(dir_, x, params, append_sh=True):
    if append_sh:
        x = jnp.concatenate([dir_, x], axis=1)
    h = jnp.maximum(x @ params["w1"].T + params["b1"], 0.0)
    h = jnp.maximum(h @ params["w2"].T + params["b2"], 0.0)
    return h @ params["w3"].T + params["b3"]


# ---------------- main ----------------

if __name__ == "__main__":
    # small shapes consistent with the module: dir = SH features, x = features.
    # N deliberately not a multiple of the tile to exercise the ragged block.
    N, D_DIR, D_X, HIDDEN, D_OUT = 1000, 4, 28, 32, 16
    D_IN = D_DIR + D_X

    key = jax.random.PRNGKey(0)
    k_dir, k_x, k_p, k_p2 = jax.random.split(key, 4)
    dir_ = jax.random.normal(k_dir, (N, D_DIR), jnp.float32)
    x = jax.random.normal(k_x, (N, D_X), jnp.float32)
    params = init_params(k_p, D_IN, HIDDEN, D_OUT)
    ref = reference_forward(dir_, x, params, append_sh=True)

    # f32 weight path; tile_n=512 -> 2-step grid with a ragged last block.
    fwd_f32 = jax.jit(functools.partial(tcnn_model_forward,
                                        append_sh=True, tile_n=512))
    out_f32 = jax.block_until_ready(
        fwd_f32(dir_, x, prepare_params(params, jnp.float32)))
    assert out_f32.shape == (N, D_OUT)
    assert jnp.allclose(out_f32, ref, atol=1e-4, rtol=1e-4), "f32 mismatch"

    # bf16 (default) matmul-input path, default tile (clamped to N).
    fwd_bf16 = jax.jit(functools.partial(tcnn_model_forward, append_sh=True))
    out_bf16 = jax.block_until_ready(fwd_bf16(dir_, x, prepare_params(params)))
    assert out_bf16.shape == (N, D_OUT)
    assert jnp.allclose(out_bf16, ref, atol=5e-2, rtol=5e-2), "bf16 mismatch"

    # append_sh=False path (MLP consumes x alone).
    params_nx = init_params(k_p2, D_X, HIDDEN, D_OUT)
    ref_nx = reference_forward(None, x, params_nx, append_sh=False)
    fwd_nx = jax.jit(functools.partial(tcnn_model_forward, append_sh=False))
    out_nx = jax.block_until_ready(
        fwd_nx(None, x, prepare_params(params_nx, jnp.float32)))
    assert out_nx.shape == (N, D_OUT)
    assert jnp.allclose(out_nx, ref_nx, atol=1e-4, rtol=1e-4), "no-concat mismatch"

    print("KERNEL_OK")
</pallas_src>

<mosaic_0001>
module attributes {stable_mosaic.version = 11 : i64} {
  func.func @_mlp_kernel(%arg0: i32, %arg1: memref<512x4xf32, #tpu.memory_space<vmem>>, %arg2: memref<512x28xf32, #tpu.memory_space<vmem>>, %arg3: memref<4x32xf32, #tpu.memory_space<vmem>>, %arg4: memref<28x32xf32, #tpu.memory_space<vmem>>, %arg5: memref<1x32xf32, #tpu.memory_space<vmem>>, %arg6: memref<32x32xf32, #tpu.memory_space<vmem>>, %arg7: memref<1x32xf32, #tpu.memory_space<vmem>>, %arg8: memref<32x16xf32, #tpu.memory_space<vmem>>, %arg9: memref<1x16xf32, #tpu.memory_space<vmem>>, %arg10: memref<512x16xf32, #tpu.memory_space<vmem>>) attributes {dimension_semantics = [#tpu.dimension_semantics<parallel>], iteration_bounds = array<i64: 2>, scalar_prefetch = 0 : i64, scratch_operands = 0 : i64, tpu.core_type = #tpu.core_type<tc>, window_params = [{transform_indices = @transform_0, window_bounds = array<i64: 512, 4>}, {transform_indices = @transform_1, window_bounds = array<i64: 512, 28>}, {pipeline_mode = #tpu.pipeline_mode<synchronous>, transform_indices = @transform_2, window_bounds = array<i64: 4, 32>}, {pipeline_mode = #tpu.pipeline_mode<synchronous>, transform_indices = @transform_3, window_bounds = array<i64: 28, 32>}, {pipeline_mode = #tpu.pipeline_mode<synchronous>, transform_indices = @transform_4, window_bounds = array<i64: 1, 32>}, {pipeline_mode = #tpu.pipeline_mode<synchronous>, transform_indices = @transform_5, window_bounds = array<i64: 32, 32>}, {pipeline_mode = #tpu.pipeline_mode<synchronous>, transform_indices = @transform_6, window_bounds = array<i64: 1, 32>}, {pipeline_mode = #tpu.pipeline_mode<synchronous>, transform_indices = @transform_7, window_bounds = array<i64: 32, 16>}, {pipeline_mode = #tpu.pipeline_mode<synchronous>, transform_indices = @transform_8, window_bounds = array<i64: 1, 16>}, {transform_indices = @transform_9, window_bounds = array<i64: 512, 16>}]} {
    %c0 = arith.constant 0 : index
    %c0_0 = arith.constant 0 : index
    %0 = vector.load %arg1[%c0, %c0_0] : memref<512x4xf32, #tpu.memory_space<vmem>>, vector<512x4xf32>
    %c0_1 = arith.constant 0 : index
    %c0_2 = arith.constant 0 : index
    %1 = vector.load %arg3[%c0_1, %c0_2] : memref<4x32xf32, #tpu.memory_space<vmem>>, vector<4x32xf32>
    %cst = arith.constant dense<0.000000e+00> : vector<512x32xf32>
    %2 = tpu.matmul %0, %1, %cst {dimension_numbers = #tpu.dot_dimension_numbers<[1], [0], [0], [1], [0, 0, 1, 1], [], []>} : vector<512x4xf32>, vector<4x32xf32>, vector<512x32xf32> -> vector<512x32xf32>
    %c0_3 = arith.constant 0 : index
    %c0_4 = arith.constant 0 : index
    %3 = vector.load %arg2[%c0_3, %c0_4] : memref<512x28xf32, #tpu.memory_space<vmem>>, vector<512x28xf32>
    %c0_5 = arith.constant 0 : index
    %c0_6 = arith.constant 0 : index
    %4 = vector.load %arg4[%c0_5, %c0_6] : memref<28x32xf32, #tpu.memory_space<vmem>>, vector<28x32xf32>
    %cst_7 = arith.constant dense<0.000000e+00> : vector<512x32xf32>
    %5 = tpu.matmul %3, %4, %cst_7 {dimension_numbers = #tpu.dot_dimension_numbers<[1], [0], [0], [1], [0, 0, 1, 1], [], []>} : vector<512x28xf32>, vector<28x32xf32>, vector<512x32xf32> -> vector<512x32xf32>
    %6 = arith.addf %2, %5 : vector<512x32xf32>
    %c0_8 = arith.constant 0 : index
    %c0_9 = arith.constant 0 : index
    %7 = vector.load %arg5[%c0_8, %c0_9] : memref<1x32xf32, #tpu.memory_space<vmem>>, vector<1x32xf32>
    %8 = vector.broadcast %7 : vector<1x32xf32> to vector<512x32xf32>
    %9 = arith.addf %6, %8 : vector<512x32xf32>
    %cst_10 = arith.constant 0.000000e+00 : f32
    %10 = vector.broadcast %cst_10 : f32 to vector<512x32xf32>
    %11 = arith.maximumf %9, %10 : vector<512x32xf32>
    %c0_11 = arith.constant 0 : index
    %c0_12 = arith.constant 0 : index
    %12 = vector.load %arg6[%c0_11, %c0_12] : memref<32x32xf32, #tpu.memory_space<vmem>>, vector<32x32xf32>
    %cst_13 = arith.constant dense<0.000000e+00> : vector<512x32xf32>
    %13 = tpu.matmul %11, %12, %cst_13 {dimension_numbers = #tpu.dot_dimension_numbers<[1], [0], [0], [1], [0, 0, 1, 1], [], []>} : vector<512x32xf32>, vector<32x32xf32>, vector<512x32xf32> -> vector<512x32xf32>
    %c0_14 = arith.constant 0 : index
    %c0_15 = arith.constant 0 : index
    %14 = vector.load %arg7[%c0_14, %c0_15] : memref<1x32xf32, #tpu.memory_space<vmem>>, vector<1x32xf32>
    %15 = vector.broadcast %14 : vector<1x32xf32> to vector<512x32xf32>
    %16 = arith.addf %13, %15 : vector<512x32xf32>
    %cst_16 = arith.constant 0.000000e+00 : f32
    %17 = vector.broadcast %cst_16 : f32 to vector<512x32xf32>
    %18 = arith.maximumf %16, %17 : vector<512x32xf32>
    %c0_17 = arith.constant 0 : index
    %c0_18 = arith.constant 0 : index
    %19 = vector.load %arg8[%c0_17, %c0_18] : memref<32x16xf32, #tpu.memory_space<vmem>>, vector<32x16xf32>
    %cst_19 = arith.constant dense<0.000000e+00> : vector<512x16xf32>
    %20 = tpu.matmul %18, %19, %cst_19 {dimension_numbers = #tpu.dot_dimension_numbers<[1], [0], [0], [1], [0, 0, 1, 1], [], []>} : vector<512x32xf32>, vector<32x16xf32>, vector<512x16xf32> -> vector<512x16xf32>
    %c0_20 = arith.constant 0 : index
    %c0_21 = arith.constant 0 : index
    %21 = vector.load %arg9[%c0_20, %c0_21] : memref<1x16xf32, #tpu.memory_space<vmem>>, vector<1x16xf32>
    %22 = vector.broadcast %21 : vector<1x16xf32> to vector<512x16xf32>
    %23 = arith.addf %20, %22 : vector<512x16xf32>
    %c0_22 = arith.constant 0 : index
    %c0_23 = arith.constant 0 : index
    %24 = vector.load %arg10[%c0_22, %c0_23] : memref<512x16xf32, #tpu.memory_space<vmem>>, vector<512x16xf32>
    tpu.vector_store %arg10[%c0_22, %c0_23], %23 {strides = array<i32>} : memref<512x16xf32, #tpu.memory_space<vmem>>, vector<512x16xf32>,
    return
  }
  func.func @transform_0(%arg0: i32) -> (i32, i32) {
    %c0_i32 = arith.constant 0 : i32
    %c0_i32_0 = arith.constant 0 : i32
    return %arg0, %c0_i32 : i32, i32
  }
  func.func @transform_1(%arg0: i32) -> (i32, i32) {
    %c0_i32 = arith.constant 0 : i32
    %c0_i32_0 = arith.constant 0 : i32
    return %arg0, %c0_i32 : i32, i32
  }
  func.func @transform_2(%arg0: i32) -> (i32, i32) {
    %c0_i32 = arith.constant 0 : i32
    %c0_i32_0 = arith.constant 0 : i32
    %c0_i32_1 = arith.constant 0 : i32
    return %c0_i32, %c0_i32_0 : i32, i32
  }
  func.func @transform_3(%arg0: i32) -> (i32, i32) {
    %c0_i32 = arith.constant 0 : i32
    %c0_i32_0 = arith.constant 0 : i32
    %c0_i32_1 = arith.constant 0 : i32
    return %c0_i32, %c0_i32_0 : i32, i32
  }
  func.func @transform_4(%arg0: i32) -> (i32, i32) {
    %c0_i32 = arith.constant 0 : i32
    %c0_i32_0 = arith.constant 0 : i32
    %c0_i32_1 = arith.constant 0 : i32
    return %c0_i32, %c0_i32_0 : i32, i32
  }
  func.func @transform_5(%arg0: i32) -> (i32, i32) {
    %c0_i32 = arith.constant 0 : i32
    %c0_i32_0 = arith.constant 0 : i32
    %c0_i32_1 = arith.constant 0 : i32
    return %c0_i32, %c0_i32_0 : i32, i32
  }
  func.func @transform_6(%arg0: i32) -> (i32, i32) {
    %c0_i32 = arith.constant 0 : i32
    %c0_i32_0 = arith.constant 0 : i32
    %c0_i32_1 = arith.constant 0 : i32
    return %c0_i32, %c0_i32_0 : i32, i32
  }
  func.func @transform_7(%arg0: i32) -> (i32, i32) {
    %c0_i32 = arith.constant 0 : i32
    %c0_i32_0 = arith.constant 0 : i32
    %c0_i32_1 = arith.constant 0 : i32
    return %c0_i32, %c0_i32_0 : i32, i32
  }
  func.func @transform_8(%arg0: i32) -> (i32, i32) {
    %c0_i32 = arith.constant 0 : i32
    %c0_i32_0 = arith.constant 0 : i32
    %c0_i32_1 = arith.constant 0 : i32
    return %c0_i32, %c0_i32_0 : i32, i32
  }
  func.func @transform_9(%arg0: i32) -> (i32, i32) {
    %c0_i32 = arith.constant 0 : i32
    %c0_i32_0 = arith.constant 0 : i32
    return %arg0, %c0_i32 : i32, i32
  }
}

</mosaic_0001>

<bundles_post_ra>
// kernel: tcnn_model_forward.1
= control target key start
LH: loop header
LB: loop body
LE: loop exit
PB: predicated region body
PF: predicated region fallthrough
CT: control target
= control target key end

     0   :  { %s4899_s30 = smov 0   ;;  %s4901_s10 = smov 0   ;;  %s5920_s0 = inlined_call_operand.vmem [shape: f32[1000,4], index: 0, kind: input, shape index: {}]   ;;  %s5921_s1 = inlined_call_operand.vmem [shape: f32[1000,28], index: 1, kind: input, shape index: {}]   ;;  %s5922_s2 = inlined_call_operand.vmem [shape: f32[4,32], index: 2, kind: input, shape index: {}]   ;;  %s5923_s3 = inlined_call_operand.vmem [shape: f32[28,32], index: 3, kind: input, shape index: {}]   ;;  %s5924_s4 = inlined_call_operand.vmem [shape: f32[1,32], index: 4, kind: input, shape index: {}]   ;;  %s5925_s5 = inlined_call_operand.vmem [shape: f32[32,32], index: 5, kind: input, shape index: {}]   ;;  %s5926_s6 = inlined_call_operand.vmem [shape: f32[1,32], index: 6, kind: input, shape index: {}]   ;;  %s5927_s7 = inlined_call_operand.vmem [shape: f32[32,16], index: 7, kind: input, shape index: {}]   ;;  %s5928_s8 = inlined_call_operand.vmem [shape: f32[1,16], index: 8, kind: input, shape index: {}]   ;;  %s5929_s9 = inlined_call_operand.vmem [shape: f32[1000,16], index: 9, kind: output, shape index: {}]  }
   0x1   :  { %s4903_s11 = smov 0  }
   0x2 LB: > { %s4912_s12 = sadd.s32 4294967295, %s4814_s11   ;;  %s4914_s13 = sadd.s32 1, %s4814_s11   ;;  %s4814_s11 = sphi %s4903_s11, %s5938_s11   ;;  %s4810_s10 = sphi %s4901_s10, %s5937_s10   ;;  %s4806_s30 = sphi %s4899_s30, %s5936_s30  }
   0x3   : > { %s222_s14 = ssub.s32 %s4814_s11, %s4914_s13  ;;  %s225_s15 = sadd.s32 1, %s4810_s10 }
   0x4   : > { %p223_p0 = scmp.eq.s32.totalorder %s222_s14, 0  ;;  %p235_p1 = scmp.ne.s32.totalorder %s4810_s10, %s4806_s30 }
   0x5   : > { %p236_p2 = scmp.eq.s32.totalorder %s4912_s12, 1  ;;  %p3615_p3 = scmp.ge.s32.totalorder %s4814_s11, 1 }
   0x6   : > { %s4922_s16 = scalar_select %p223_p0, %s4810_s10, %s225_s15  }
   0x7   : > { %p4924_p4 = por %p236_p2, %p235_p1  ;;  %p315_p5 = scmp.lt.s32.totalorder %s4814_s11, 3 }
   0x9   : > { %p316_p6 = pnand %p3615_p3, %p315_p5 }
   0xa   : > { %v525_v0 = vld [vmem:[%s5923_s3] sm:$0xff] (!%p316_p6)  ;;  %v526_v1 = vld [vmem:[%s5923_s3 + $0x8] sm:$0xff] (!%p316_p6)  ;;  %v527_v2 = vld [vmem:[%s5923_s3 + $0x10] sm:$0xff] (!%p316_p6)  ;;  %vm722_vm0 = vcmask (!%p316_p6), 1043456   ;;  %s4938_s24 = sshll.u32 (!%p316_p6), %s4912_s12, 6  ;;  %vm4848_vm1 = vmmov (!%p316_p6), 1  }
   0xb   : > { %319 = sbr.rel (%p316_p6) target bundleno = 1000 (0x3e8), region = 56  ;;  %v4581_v3 = vpack.c.bf16 (!%p316_p6), %v526_v1, %v525_v0  ;;  %v528_v4 = vld [vmem:[%s5923_s3 + $0x18] sm:$0xf] (!%p316_p6)  ;;  %p368_p7 = scmp.lt.s32.totalorder (!%p316_p6), %s4938_s24, 124  ;;  %vm4586_vm2 = vmpackc.low (!%p316_p6), %vm722_vm0, %vm4848_vm1  ;;  %vm529_vm3 = vcmask (!%p316_p6), 228352   ;;  %vm1111_vm4 = vcmask (!%p316_p6), 31744  }
   0xc   : > { %v4585_v5 = vpack.c.bf16 (!%p316_p6), %v528_v4, %v527_v2  ;;  %v460_v6 = vld [vmem:[%s5922_s2] sm:$0xf] (!%p316_p6)  ;;  %vm1838_vm5 = vcmask (!%p316_p6), 261120   ;;  %s360_s29 = sand.u32 (!%p316_p6), 1, %s4806_s30   ;;  %vm3068_vm6 = vcmask (!%p316_p6), 130048  }
   0xd   : > { %4582 = vmatprep.subr.bf16.mxu0 (!%p316_p6), %v4581_v3  ;;  %s3616_s11 = sshll.u32 (!%p316_p6), %s360_s29, 9 }
   0xe   : > { %4584 = vmatpush3.bf16.msra.mxu0 (!%p316_p6), %v4581_v3  ;;  %s5522_s18 = scalar_lea.vmem (!%p316_p6), [#allocation2], %s3616_s11  }
   0xf   : > { %4587 = vmatprep.subr.msk.bf16.mxu0 (!%p316_p6), %vm4586_vm2, %v4585_v5 }
  0x12   : > { %s4946_s27 = scalar_select %p368_p7, %s4938_s24, 124  ;;  %4590 = vmatpush3.bf16.msk.msra.mxu0 %vm4586_vm2, %v4585_v5 }
  0x13   : > { %4275 = vmatprep.subr.msk.mxu0 %vm722_vm0, %v460_v6  ;;  %s3141_s30 = ssub.s32 (%p4924_p4), 125, %s4938_s24  ;;  %s3899_s19 = sshll.u32 (%p4924_p4), %s4912_s12, 9 }
  0x14   : > { %s3618_s28 = sshll.u32 %s4946_s27, 3  ;;  %p3142_p8 = scmp.lt.s32.totalorder (%p4924_p4), %s3141_s30, 64 }
  0x15   : > { %s4954_s14 = scalar_lea.vmem %s5921_s1, %s3618_s28  ;;  %s5090_s21 = scalar_lea.vmem %s5920_s0, %s3618_s28 }
  0x16   : > { %v461_v7 = vld [vmem:[%s4954_s14] sm:$0xff]  ;;  %v462_v8 = vld [vmem:[%s4954_s14 + $0x8] sm:$0xff]  ;;  %v463_v9 = vld [vmem:[%s4954_s14 + $0x10] sm:$0xff] }
  0x17   : > { %4179 = vmatprep.mubr.msk.f32.mxu0 %vm529_vm3, %v461_v7  ;;  %v464_v10 = vld [vmem:[%s4954_s14 + $0x18] sm:$0xff]  ;;  %v465_v11 = vld [vmem:[%s4954_s14 + $0x20] sm:$0xff]  ;;  %v466_v12 = vld [vmem:[%s4954_s14 + $0x28] sm:$0xff] }
  0x18   : > { %4180 = vmatmul.mubr.msk.f32.vlgmr.msra.gmra.mrb[0].mxu0 %vm529_vm3, %v462_v8  ;;  %v467_v13 = vld [vmem:[%s4954_s14 + $0x30] sm:$0xff]  ;;  %v468_v14 = vld [vmem:[%s4954_s14 + $0x38] sm:$0xff]  ;;  %v469_v15 = vld [vmem:[%s4954_s14 + $0x40] sm:$0xff] }
  0x19   : > { %4276 = vmatpush3.msk.msra.mxu0 %vm722_vm0, %v460_v6  ;;  %4182 = vmatprep.mubr.msk.f32.mxu0 %vm529_vm3, %v463_v9  ;;  %v470_v16 = vld [vmem:[%s4954_s14 + $0x48] sm:$0xff]  ;;  %v471_v17 = vld [vmem:[%s4954_s14 + $0x50] sm:$0xff]  ;;  %v472_v18 = vld [vmem:[%s4954_s14 + $0x58] sm:$0xff] }
  0x1a   : > { %v473_v19 = vld [vmem:[%s4954_s14 + $0x60] sm:$0xff]  ;;  %v474_v20 = vld [vmem:[%s4954_s14 + $0x68] sm:$0xff]  ;;  %v475_v21 = vld [vmem:[%s4954_s14 + $0x70] sm:$0xff] }
  0x1b   : > { %v476_v22 = vld [vmem:[%s4954_s14 + $0x78] sm:$0xff]  ;;  %v477_v23 = vld [vmem:[%s4954_s14 + $0x80] sm:$0xff]  ;;  %v478_v24 = vld [vmem:[%s4954_s14 + $0x88] sm:$0xff] }
  0x1c   : > { %4183 = vmatmul.mubr.msk.f32.gmra.mrb[2].mxu0 %vm529_vm3, %v464_v10  ;;  %v479_v25 = vld [vmem:[%s4954_s14 + $0x90] sm:$0xff]  ;;  %v480_v26 = vld [vmem:[%s4954_s14 + $0x98] sm:$0xff]  ;;  %v481_v27 = vld [vmem:[%s4954_s14 + $0xa0] sm:$0xff] }
  0x1d   : > { %4185 = vmatprep.mubr.msk.f32.mxu0 %vm529_vm3, %v465_v11  ;;  %v482_v28 = vld [vmem:[%s4954_s14 + $0xa8] sm:$0xff]  ;;  %v483_v29 = vld [vmem:[%s4954_s14 + $0xb0] sm:$0xff]  ;;  %v484_v30 = vld [vmem:[%s4954_s14 + $0xb8] sm:$0xff] }
  0x1e   : > { %v485_v31 = vld [vmem:[%s4954_s14 + $0xc0] sm:$0xff]  ;;  %v486_v32 = vld [vmem:[%s4954_s14 + $0xc8] sm:$0xff]  ;;  %v487_v33 = vld [vmem:[%s4954_s14 + $0xd0] sm:$0xff] }
  0x1f   : > { %v488_v34 = vld [vmem:[%s4954_s14 + $0xd8] sm:$0xff]  ;;  %v489_v35 = vld [vmem:[%s4954_s14 + $0xe0] sm:$0xff]  ;;  %v490_v36 = vld [vmem:[%s4954_s14 + $0xe8] sm:$0xff] }
  0x20   : > { %4186 = vmatmul.mubr.msk.f32.gmra.mrb[4].mxu0 %vm529_vm3, %v466_v12  ;;  %v491_v37 = vld [vmem:[%s4954_s14 + $0xf0] sm:$0xff]  ;;  %v492_v38 = vld [vmem:[%s4954_s14 + $0xf8] sm:$0xff]  ;;  %v493_v39 = vld [vmem:[%s4954_s14 + $0x100] sm:$0xff] }
  0x21   : > { %4188 = vmatprep.mubr.msk.f32.mxu0 %vm529_vm3, %v467_v13  ;;  %v494_v40 = vld [vmem:[%s4954_s14 + $0x108] sm:$0xff]  ;;  %v495_v41 = vld [vmem:[%s4954_s14 + $0x110] sm:$0xff]  ;;  %v496_v42 = vld [vmem:[%s4954_s14 + $0x118] sm:$0xff] }
  0x22   : > { %v497_v43 = vld [vmem:[%s4954_s14 + $0x120] sm:$0xff]  ;;  %v498_v44 = vld [vmem:[%s4954_s14 + $0x128] sm:$0xff]  ;;  %v499_v45 = vld [vmem:[%s4954_s14 + $0x130] sm:$0xff] }
  0x23   : > { %v500_v46 = vld [vmem:[%s4954_s14 + $0x138] sm:$0xff]  ;;  %v501_v47 = vld [vmem:[%s4954_s14 + $0x140] sm:$0xff]  ;;  %v502_v48 = vld [vmem:[%s4954_s14 + $0x148] sm:$0xff] }
  0x24   : > { %4189 = vmatmul.mubr.msk.f32.gmra.mrb[6].mxu0 %vm529_vm3, %v468_v14  ;;  %v503_v49 = vld [vmem:[%s4954_s14 + $0x150] sm:$0xff]  ;;  %v504_v50 = vld [vmem:[%s4954_s14 + $0x158] sm:$0xff]  ;;  %v505_v51 = vld [vmem:[%s4954_s14 + $0x160] sm:$0xff] }
  0x25   : > { %4191 = vmatprep.mubr.msk.f32.mxu0 %vm529_vm3, %v469_v15  ;;  %v506_v52 = vld [vmem:[%s4954_s14 + $0x168] sm:$0xff]  ;;  %v507_v53 = vld [vmem:[%s4954_s14 + $0x170] sm:$0xff]  ;;  %v508_v54 = vld [vmem:[%s4954_s14 + $0x178] sm:$0xff] }
  0x26   : > { %v509_v55 = vld [vmem:[%s4954_s14 + $0x180] sm:$0xff]  ;;  %v510_v56 = vld [vmem:[%s4954_s14 + $0x188] sm:$0xff]  ;;  %v511_v57 = vld [vmem:[%s4954_s14 + $0x190] sm:$0xff] }
  0x27   : > { %v512_v58 = vld [vmem:[%s4954_s14 + $0x198] sm:$0xff]  ;;  %v513_v59 = vld [vmem:[%s4954_s14 + $0x1a0] sm:$0xff]  ;;  %v514_v60 = vld [vmem:[%s4954_s14 + $0x1a8] sm:$0xff] }
  0x28   : > { %4192 = vmatmul.mubr.msk.f32.gmra.mrb[8].mxu0 %vm529_vm3, %v470_v16  ;;  %v515_v61 = vld [vmem:[%s4954_s14 + $0x1b0] sm:$0xff]  ;;  %v516_v62 = vld [vmem:[%s4954_s14 + $0x1b8] sm:$0xff]  ;;  %v517_v63 = vld [vmem:[%s4954_s14 + $0x1c0] sm:$0xff] }
  0x29   : > { %4194 = vmatprep.mubr.msk.f32.mxu0 %vm529_vm3, %v471_v17  ;;  %v518_v0 = vld [vmem:[%s4954_s14 + $0x1c8] sm:$0xff]  ;;  %v519_v1 = vld [vmem:[%s4954_s14 + $0x1d0] sm:$0xff]  ;;  %v520_v2 = vld [vmem:[%s4954_s14 + $0x1d8] sm:$0xff] }
  0x2a   : > { %v521_v3 = vld [vmem:[%s4954_s14 + $0x1e0] sm:$0xff]  ;;  %v522_v4 = vld [vmem:[%s4954_s14 + $0x1e8] sm:$0xff]  ;;  %v523_v5 = vld [vmem:[%s4954_s14 + $0x1f0] sm:$0xff] }
  0x2b   : > { %v524_v6 = vld [vmem:[%s4954_s14 + $0x1f8] sm:$0xff]  ;;  %v396_v7 = vld [vmem:[%s5090_s21] sm:$0xff]  ;;  %v1828_v9 = vld [vmem:[%s5925_s5 + $0x8] sm:$0xff] }
  0x2c   : > { %4195 = vmatmul.mubr.msk.f32.gmra.mrb[10].mxu0 %vm529_vm3, %v472_v18  ;;  %v1827_v8 = vld [vmem:[%s5925_s5] sm:$0xff]  ;;  %v397_v10 = vld [vmem:[%s5090_s21 + $0x8] sm:$0xff]  ;;  %v398_v12 = vld [vmem:[%s5090_s21 + $0x10] sm:$0xff] }
  0x2d   : > { %4197 = vmatprep.mubr.msk.f32.mxu0 %vm529_vm3, %v473_v19  ;;  %v4591_v11 = vpack.c.bf16 %v1828_v9, %v1827_v8  ;;  %v399_v13 = vld [vmem:[%s5090_s21 + $0x18] sm:$0xff]  ;;  %v400_v14 = vld [vmem:[%s5090_s21 + $0x20] sm:$0xff]  ;;  %v401_v15 = vld [vmem:[%s5090_s21 + $0x28] sm:$0xff] }
  0x2e   : > { %v402_v16 = vld [vmem:[%s5090_s21 + $0x30] sm:$0xff]  ;;  %v403_v17 = vld [vmem:[%s5090_s21 + $0x38] sm:$0xff]  ;;  %v404_v18 = vld [vmem:[%s5090_s21 + $0x40] sm:$0xff] }
  0x2f   : > { %4592 = vmatprep.subr.bf16.mxu1 %v4591_v11  ;;  %v405_v19 = vld [vmem:[%s5090_s21 + $0x48] sm:$0xff]  ;;  %v455_v8 = vld [vmem:[%s5090_s21 + $0x1d8] sm:$0xff]  ;;  %v456_v9 = vld [vmem:[%s5090_s21 + $0x1e0] sm:$0xff] }
  0x30   : > { %4198 = vmatmul.mubr.msk.f32.gmra.mrb[12].mxu0 %vm529_vm3, %v474_v20  ;;  %4594 = vmatpush3.bf16.msra.mxu1 %v4591_v11  ;;  %v406_v20 = vld [vmem:[%s5090_s21 + $0x50] sm:$0xff] }
  0x31   : > { %4200 = vmatprep.mubr.msk.f32.mxu0 %vm529_vm3, %v475_v21  ;;  %v407_v21 = vld [vmem:[%s5090_s21 + $0x58] sm:$0xff]  ;;  %v458_v11 = vld [vmem:[%s5090_s21 + $0x1f0] sm:$0xff] }
  0x34   : > { %4201 = vmatmul.mubr.msk.f32.gmra.mrb[14].mxu0 %vm529_vm3, %v476_v22  ;;  %v408_v22 = vld [vmem:[%s5090_s21 + $0x60] sm:$0xff] }
  0x35   : > { %4203 = vmatprep.mubr.msk.f32.mxu0 %vm529_vm3, %v477_v23  ;;  %v409_v23 = vld [vmem:[%s5090_s21 + $0x68] sm:$0xff] }
  0x38   : > { %4204 = vmatmul.mubr.msk.f32.gmra.mrb[16].mxu0 %vm529_vm3, %v478_v24  ;;  %v410_v24 = vld [vmem:[%s5090_s21 + $0x70] sm:$0xff] }
  0x39   : > { %4206 = vmatprep.mubr.msk.f32.mxu0 %vm529_vm3, %v479_v25  ;;  %v411_v25 = vld [vmem:[%s5090_s21 + $0x78] sm:$0xff] }
  0x3c   : > { %4207 = vmatmul.mubr.msk.f32.gmra.mrb[18].mxu0 %vm529_vm3, %v480_v26  ;;  %v412_v26 = vld [vmem:[%s5090_s21 + $0x80] sm:$0xff] }
  0x3d   : > { %4209 = vmatprep.mubr.msk.f32.mxu0 %vm529_vm3, %v481_v27  ;;  %v413_v27 = vld [vmem:[%s5090_s21 + $0x88] sm:$0xff] }
  0x40   : > { %4210 = vmatmul.mubr.msk.f32.gmra.mrb[20].mxu0 %vm529_vm3, %v482_v28  ;;  %v414_v28 = vld [vmem:[%s5090_s21 + $0x90] sm:$0xff] }
  0x41   : > { %4212 = vmatprep.mubr.msk.f32.mxu0 %vm529_vm3, %v483_v29  ;;  %v415_v29 = vld [vmem:[%s5090_s21 + $0x98] sm:$0xff] }
  0x44   : > { %4213 = vmatmul.mubr.msk.f32.gmra.mrb[22].mxu0 %vm529_vm3, %v484_v30  ;;  %v416_v30 = vld [vmem:[%s5090_s21 + $0xa0] sm:$0xff] }
  0x45   : > { %4215 = vmatprep.mubr.msk.f32.mxu0 %vm529_vm3, %v485_v31  ;;  %v417_v31 = vld [vmem:[%s5090_s21 + $0xa8] sm:$0xff] }
  0x48   : > { %4216 = vmatmul.mubr.msk.f32.gmra.mrb[24].mxu0 %vm529_vm3, %v486_v32  ;;  %v418_v32 = vld [vmem:[%s5090_s21 + $0xb0] sm:$0xff] }
  0x49   : > { %4218 = vmatprep.mubr.msk.f32.mxu0 %vm529_vm3, %v487_v33  ;;  %v419_v33 = vld [vmem:[%s5090_s21 + $0xb8] sm:$0xff] }
  0x4c   : > { %4219 = vmatmul.mubr.msk.f32.gmra.mrb[26].mxu0 %vm529_vm3, %v488_v34  ;;  %v420_v34 = vld [vmem:[%s5090_s21 + $0xc0] sm:$0xff] }
  0x4d   : > { %4221 = vmatprep.mubr.msk.f32.mxu0 %vm529_vm3, %v489_v35  ;;  %v421_v35 = vld [vmem:[%s5090_s21 + $0xc8] sm:$0xff] }
  0x50   : > { %4222 = vmatmul.mubr.msk.f32.gmra.mrb[28].mxu0 %vm529_vm3, %v490_v36  ;;  %v422_v36 = vld [vmem:[%s5090_s21 + $0xd0] sm:$0xff] }
  0x51   : > { %4224 = vmatprep.mubr.msk.f32.mxu0 %vm529_vm3, %v491_v37  ;;  %v423_v37 = vld [vmem:[%s5090_s21 + $0xd8] sm:$0xff] }
  0x54   : > { %4225 = vmatmul.mubr.msk.f32.gmra.mrb[30].mxu0 %vm529_vm3, %v492_v38  ;;  %v424_v38 = vld [vmem:[%s5090_s21 + $0xe0] sm:$0xff] }
  0x55   : > { %4227 = vmatprep.mubr.msk.f32.mxu0 %vm529_vm3, %v493_v39  ;;  %v425_v39 = vld [vmem:[%s5090_s21 + $0xe8] sm:$0xff] }
  0x58   : > { %4228 = vmatmul.mubr.msk.f32.gmra.mrb[32].mxu0 %vm529_vm3, %v494_v40  ;;  %v426_v40 = vld [vmem:[%s5090_s21 + $0xf0] sm:$0xff] }
  0x59   : > { %4230 = vmatprep.mubr.msk.f32.mxu0 %vm529_vm3, %v495_v41  ;;  %v427_v41 = vld [vmem:[%s5090_s21 + $0xf8] sm:$0xff] }
  0x5c   : > { %4231 = vmatmul.mubr.msk.f32.gmra.mrb[34].mxu0 %vm529_vm3, %v496_v42  ;;  %v428_v42 = vld [vmem:[%s5090_s21 + $0x100] sm:$0xff] }
  0x5d   : > { %4233 = vmatprep.mubr.msk.f32.mxu0 %vm529_vm3, %v497_v43  ;;  %v429_v43 = vld [vmem:[%s5090_s21 + $0x108] sm:$0xff] }
  0x60   : > { %4234 = vmatmul.mubr.msk.f32.gmra.mrb[36].mxu0 %vm529_vm3, %v498_v44  ;;  %v430_v44 = vld [vmem:[%s5090_s21 + $0x110] sm:$0xff] }
  0x61   : > { %4236 = vmatprep.mubr.msk.f32.mxu0 %vm529_vm3, %v499_v45  ;;  %v431_v45 = vld [vmem:[%s5090_s21 + $0x118] sm:$0xff] }
  0x64   : > { %4237 = vmatmul.mubr.msk.f32.gmra.mrb[38].mxu0 %vm529_vm3, %v500_v46  ;;  %v432_v46 = vld [vmem:[%s5090_s21 + $0x120] sm:$0xff] }
  0x65   : > { %4239 = vmatprep.mubr.msk.f32.mxu0 %vm529_vm3, %v501_v47  ;;  %v433_v47 = vld [vmem:[%s5090_s21 + $0x128] sm:$0xff] }
  0x68   : > { %4240 = vmatmul.mubr.msk.f32.gmra.mrb[40].mxu0 %vm529_vm3, %v502_v48  ;;  %v434_v48 = vld [vmem:[%s5090_s21 + $0x130] sm:$0xff] }
  0x69   : > { %4242 = vmatprep.mubr.msk.f32.mxu0 %vm529_vm3, %v503_v49  ;;  %v435_v49 = vld [vmem:[%s5090_s21 + $0x138] sm:$0xff] }
  0x6c   : > { %4243 = vmatmul.mubr.msk.f32.gmra.mrb[42].mxu0 %vm529_vm3, %v504_v50  ;;  %v436_v50 = vld [vmem:[%s5090_s21 + $0x140] sm:$0xff] }
  0x6d   : > { %4245 = vmatprep.mubr.msk.f32.mxu0 %vm529_vm3, %v505_v51  ;;  %v437_v51 = vld [vmem:[%s5090_s21 + $0x148] sm:$0xff] }
  0x70   : > { %4246 = vmatmul.mubr.msk.f32.gmra.mrb[44].mxu0 %vm529_vm3, %v506_v52  ;;  %v438_v52 = vld [vmem:[%s5090_s21 + $0x150] sm:$0xff] }
  0x71   : > { %4248 = vmatprep.mubr.msk.f32.mxu0 %vm529_vm3, %v507_v53  ;;  %v439_v53 = vld [vmem:[%s5090_s21 + $0x158] sm:$0xff] }
  0x74   : > { %4249 = vmatmul.mubr.msk.f32.gmra.mrb[46].mxu0 %vm529_vm3, %v508_v54  ;;  %v440_v54 = vld [vmem:[%s5090_s21 + $0x160] sm:$0xff] }
  0x75   : > { %4251 = vmatprep.mubr.msk.f32.mxu0 %vm529_vm3, %v509_v55  ;;  %v1829_v55 = vld [vmem:[%s5925_s5 + $0x10] sm:$0xff] }
  0x78   : > { %4252 = vmatmul.mubr.msk.f32.gmra.mrb[48].mxu0 %vm529_vm3, %v510_v56  ;;  %v1830_v56 = vld [vmem:[%s5925_s5 + $0x18] sm:$0xff] }
  0x79   : > { %4254 = vmatprep.mubr.msk.f32.mxu0 %vm529_vm3, %v511_v57  ;;  %v4595_v57 = vpack.c.bf16 %v1830_v56, %v1829_v55 }
  0x7b   : > { %4596 = vmatprep.subr.bf16.mxu1 %v4595_v57 }
  0x7c   : > { %4255 = vmatmul.mubr.msk.f32.gmra.mrb[50].mxu0 %vm529_vm3, %v512_v58  ;;  %v441_v58 = vld [vmem:[%s5090_s21 + $0x168] sm:$0xff]  ;;  %4598 = vmatpush3.bf16.msra.mxu1 %v4595_v57 }
  0x7d   : > { %4257 = vmatprep.mubr.msk.f32.mxu0 %vm529_vm3, %v513_v59  ;;  %v442_v59 = vld [vmem:[%s5090_s21 + $0x170] sm:$0xff] }
  0x80   : > { %4258 = vmatmul.mubr.msk.f32.gmra.mrb[52].mxu0 %vm529_vm3, %v514_v60  ;;  %v443_v60 = vld [vmem:[%s5090_s21 + $0x178] sm:$0xff] }
  0x81   : > { %4260 = vmatprep.mubr.msk.f32.mxu0 %vm529_vm3, %v515_v61  ;;  %v444_v61 = vld [vmem:[%s5090_s21 + $0x180] sm:$0xff] }
  0x84   : > { %4261 = vmatmul.mubr.msk.f32.gmra.mrb[54].mxu0 %vm529_vm3, %v516_v62  ;;  %v445_v62 = vld [vmem:[%s5090_s21 + $0x188] sm:$0xff] }
  0x85   : > { %4263 = vmatprep.mubr.msk.f32.mxu0 %vm529_vm3, %v517_v63  ;;  %v446_v63 = vld [vmem:[%s5090_s21 + $0x190] sm:$0xff] }
  0x88   : > { %4264 = vmatmul.mubr.msk.f32.gmra.mrb[56].mxu0 %vm529_vm3, %v518_v0  ;;  %v447_v0 = vld [vmem:[%s5090_s21 + $0x198] sm:$0xff] }
  0x89   : > { %4266 = vmatprep.mubr.msk.f32.mxu0 %vm529_vm3, %v519_v1  ;;  %v448_v1 = vld [vmem:[%s5090_s21 + $0x1a0] sm:$0xff] }
  0x8c   : > { %4267 = vmatmul.mubr.msk.f32.gmra.mrb[58].mxu0 %vm529_vm3, %v520_v2  ;;  %v449_v2 = vld [vmem:[%s5090_s21 + $0x1a8] sm:$0xff] }
  0x8d   : > { %4269 = vmatprep.mubr.msk.f32.mxu0 %vm529_vm3, %v521_v3  ;;  %v450_v3 = vld [vmem:[%s5090_s21 + $0x1b0] sm:$0xff] }
  0x90   : > { %4270 = vmatmul.mubr.msk.f32.gmra.mrb[60].mxu0 %vm529_vm3, %v522_v4  ;;  %v451_v4 = vld [vmem:[%s5090_s21 + $0x1b8] sm:$0xff] }
  0x91   : > { %4272 = vmatprep.mubr.msk.f32.mxu0 %vm529_vm3, %v523_v5  ;;  %v452_v5 = vld [vmem:[%s5090_s21 + $0x1c0] sm:$0xff] }
  0x94   : > { %4273 = vmatmul.mubr.msk.f32.gmra.mrb[62].mxu0 %vm529_vm3, %v524_v6  ;;  %v453_v6 = vld [vmem:[%s5090_s21 + $0x1c8] sm:$0xff] }
  0x95   : > { %4277 = vmatprep.mubr.msk.f32.mxu0 %vm1111_vm4, %v396_v7  ;;  %v454_v7 = vld [vmem:[%s5090_s21 + $0x1d0] sm:$0xff] }
  0x98   : > { %4278 = vmatmul.mubr.msk.f32.vlgmr.msra.gmra.mrb[0].mxu0 %vm1111_vm4, %v397_v10  ;;  %v457_v10 = vld [vmem:[%s5090_s21 + $0x1e8] sm:$0xff] }
  0x99   : > { %4280 = vmatprep.mubr.msk.f32.mxu0 %vm1111_vm4, %v398_v12  ;;  %v459_v12 = vld [vmem:[%s5090_s21 + $0x1f8] sm:$0xff]  ;;  %s5721_s21 = scalar_lea.vmem (%p4924_p4), %s5929_s9, %s3899_s19  }
  0x9c   : > { %4281 = vmatmul.mubr.msk.f32.gmra.mrb[2].mxu0 %vm1111_vm4, %v399_v13  ;;  %v2480_v13 = vld [vmem:[%s5927_s7] sm:$0xff] }
  0x9d   : > { %4283 = vmatprep.mubr.msk.f32.mxu0 %vm1111_vm4, %v400_v14  ;;  %v2481_v14 = vld [vmem:[%s5927_s7 + $0x8] sm:$0xff] }
  0xa0   : > { %4284 = vmatmul.mubr.msk.f32.gmra.mrb[4].mxu0 %vm1111_vm4, %v401_v15  ;;  %v4599_v15 = vpack.c.bf16 %v2481_v14, %v2480_v13 }
  0xa1   : > { %4286 = vmatprep.mubr.msk.f32.mxu0 %vm1111_vm4, %v402_v16  ;;  %v5245_v16 = vld [vmem:[%s5924_s4] ss:$0 sm:$0xff] }
  0xa2   : > { %4600 = vmatprep.subr.bf16.mxu1 %v4599_v15 }
  0xa4   : > { %4287 = vmatmul.mubr.msk.f32.gmra.mrb[6].mxu0 %vm1111_vm4, %v403_v17 }
  0xa5   : > { %4289 = vmatprep.mubr.msk.f32.mxu0 %vm1111_vm4, %v404_v18 }
  0xa8   : > { %4290 = vmatmul.mubr.msk.f32.gmra.mrb[8].mxu0 %vm1111_vm4, %v405_v19 }
  0xa9   : > { %4292 = vmatprep.mubr.msk.f32.mxu0 %vm1111_vm4, %v406_v20 }
  0xac   : > { %4293 = vmatmul.mubr.msk.f32.gmra.mrb[10].mxu0 %vm1111_vm4, %v407_v21  ;;  %v2482_v21 = vld [vmem:[%s5927_s7 + $0x10] sm:$0xff] }
  0xad   : > { %4295 = vmatprep.mubr.msk.f32.mxu0 %vm1111_vm4, %v408_v22  ;;  %v2483_v22 = vld [vmem:[%s5927_s7 + $0x18] sm:$0xff] }
  0xb0   : > { %4296 = vmatmul.mubr.msk.f32.gmra.mrb[12].mxu0 %vm1111_vm4, %v409_v23 }
  0xb1   : > { %4298 = vmatprep.mubr.msk.f32.mxu0 %vm1111_vm4, %v410_v24 }
  0xb4   : > { %4299 = vmatmul.mubr.msk.f32.gmra.mrb[14].mxu0 %vm1111_vm4, %v411_v25 }
  0xb5   : > { %4301 = vmatprep.mubr.msk.f32.mxu0 %vm1111_vm4, %v412_v26 }
  0xb8   : > { %4302 = vmatmul.mubr.msk.f32.gmra.mrb[16].mxu0 %vm1111_vm4, %v413_v27 }
  0xb9   : > { %4304 = vmatprep.mubr.msk.f32.mxu0 %vm1111_vm4, %v414_v28  ;;  %v4603_v28 = vpack.c.bf16 %v2483_v22, %v2482_v21 }
  0xbc   : > { %4305 = vmatmul.mubr.msk.f32.gmra.mrb[18].mxu0 %vm1111_vm4, %v415_v29 }
  0xbd   : > { %4307 = vmatprep.mubr.msk.f32.mxu0 %vm1111_vm4, %v416_v30 }
  0xc0   : > { %4308 = vmatmul.mubr.msk.f32.gmra.mrb[20].mxu0 %vm1111_vm4, %v417_v31 }
  0xc1   : > { %4310 = vmatprep.mubr.msk.f32.mxu0 %vm1111_vm4, %v418_v32 }
  0xc4   : > { %4311 = vmatmul.mubr.msk.f32.gmra.mrb[22].mxu0 %vm1111_vm4, %v419_v33 }
  0xc5   : > { %4313 = vmatprep.mubr.msk.f32.mxu0 %vm1111_vm4, %v420_v34 }
  0xc8   : > { %4314 = vmatmul.mubr.msk.f32.gmra.mrb[24].mxu0 %vm1111_vm4, %v421_v35 }
  0xc9   : > { %4316 = vmatprep.mubr.msk.f32.mxu0 %vm1111_vm4, %v422_v36 }
  0xcc   : > { %4317 = vmatmul.mubr.msk.f32.gmra.mrb[26].mxu0 %vm1111_vm4, %v423_v37 }
  0xcd   : > { %4319 = vmatprep.mubr.msk.f32.mxu0 %vm1111_vm4, %v424_v38 }
  0xd0   : > { %4320 = vmatmul.mubr.msk.f32.gmra.mrb[28].mxu0 %vm1111_vm4, %v425_v39 }
  0xd1   : > { %4322 = vmatprep.mubr.msk.f32.mxu0 %vm1111_vm4, %v426_v40 }
  0xd4   : > { %4323 = vmatmul.mubr.msk.f32.gmra.mrb[30].mxu0 %vm1111_vm4, %v427_v41 }
  0xd5   : > { %4325 = vmatprep.mubr.msk.f32.mxu0 %vm1111_vm4, %v428_v42 }
  0xd8   : > { %4326 = vmatmul.mubr.msk.f32.gmra.mrb[32].mxu0 %vm1111_vm4, %v429_v43 }
  0xd9   : > { %4328 = vmatprep.mubr.msk.f32.mxu0 %vm1111_vm4, %v430_v44 }
  0xdc   : > { %4329 = vmatmul.mubr.msk.f32.gmra.mrb[34].mxu0 %vm1111_vm4, %v431_v45 }
  0xdd   : > { %4331 = vmatprep.mubr.msk.f32.mxu0 %vm1111_vm4, %v432_v46 }
  0xe0   : > { %4332 = vmatmul.mubr.msk.f32.gmra.mrb[36].mxu0 %vm1111_vm4, %v433_v47 }
  0xe1   : > { %4334 = vmatprep.mubr.msk.f32.mxu0 %vm1111_vm4, %v434_v48 }
  0xe4   : > { %4335 = vmatmul.mubr.msk.f32.gmra.mrb[38].mxu0 %vm1111_vm4, %v435_v49 }
  0xe5   : > { %4337 = vmatprep.mubr.msk.f32.mxu0 %vm1111_vm4, %v436_v50 }
  0xe8   : > { %4338 = vmatmul.mubr.msk.f32.gmra.mrb[40].mxu0 %vm1111_vm4, %v437_v51 }
  0xe9   : > { %4340 = vmatprep.mubr.msk.f32.mxu0 %vm1111_vm4, %v438_v52 }
  0xec   : > { %4341 = vmatmul.mubr.msk.f32.gmra.mrb[42].mxu0 %vm1111_vm4, %v439_v53 }
  0xed   : > { %4343 = vmatprep.mubr.msk.f32.mxu0 %vm1111_vm4, %v440_v54 }
  0xf0   : > { %4344 = vmatmul.mubr.msk.f32.gmra.mrb[44].mxu0 %vm1111_vm4, %v441_v58 }
  0xf1   : > { %4346 = vmatprep.mubr.msk.f32.mxu0 %vm1111_vm4, %v442_v59 }
  0xf4   : > { %4347 = vmatmul.mubr.msk.f32.gmra.mrb[46].mxu0 %vm1111_vm4, %v443_v60 }
  0xf5   : > { %4349 = vmatprep.mubr.msk.f32.mxu0 %vm1111_vm4, %v444_v61 }
  0xf8   : > { %4350 = vmatmul.mubr.msk.f32.gmra.mrb[48].mxu0 %vm1111_vm4, %v445_v62 }
  0xf9   : > { %4352 = vmatprep.mubr.msk.f32.mxu0 %vm1111_vm4, %v446_v63 }
  0xfc   : > { %4353 = vmatmul.mubr.msk.f32.gmra.mrb[50].mxu0 %vm1111_vm4, %v447_v0 }
  0xfd   : > { %4355 = vmatprep.mubr.msk.f32.mxu0 %vm1111_vm4, %v448_v1 }
 0x100   : > { %4356 = vmatmul.mubr.msk.f32.gmra.mrb[52].mxu0 %vm1111_vm4, %v449_v2 }
 0x101   : > { %4358 = vmatprep.mubr.msk.f32.mxu0 %vm1111_vm4, %v450_v3 }
 0x104   : > { %4359 = vmatmul.mubr.msk.f32.gmra.mrb[54].mxu0 %vm1111_vm4, %v451_v4 }
 0x105   : > { %4361 = vmatprep.mubr.msk.f32.mxu0 %vm1111_vm4, %v452_v5 }
 0x108   : > { %4362 = vmatmul.mubr.msk.f32.gmra.mrb[56].mxu0 %vm1111_vm4, %v453_v6 }
 0x109   : > { %4364 = vmatprep.mubr.msk.f32.mxu0 %vm1111_vm4, %v454_v7 }
 0x10c   : > { %4365 = vmatmul.mubr.msk.f32.gmra.mrb[58].mxu0 %vm1111_vm4, %v455_v8 }
 0x10d   : > { %4367 = vmatprep.mubr.msk.f32.mxu0 %vm1111_vm4, %v456_v9 }
 0x110   : > { %4368 = vmatmul.mubr.msk.f32.gmra.mrb[60].mxu0 %vm1111_vm4, %v457_v10 }
 0x111   : > { %4370 = vmatprep.mubr.msk.f32.mxu0 %vm1111_vm4, %v458_v11 }
 0x114   : > { %4371 = vmatmul.mubr.msk.f32.gmra.mrb[62].mxu0 %vm1111_vm4, %v459_v12 }
 0x16b   : > { %v4279_v17 = vpop.f32.mrb[0].mxu0 }
 0x16c   : > { %v1700_v18 = vadd.f32 %v4279_v17, %v5245_v16  ;;  %v1373_v19 = vpop.f32.mrb[1].mxu0 }
 0x16d   : > { %v1699_v20 = vadd.f32 %v5245_v16, %v1373_v19 }
 0x16e   : > { %v1764_v25 = vmax.f32 %v1700_v18, 0.0 }
 0x16f   : > { %v1763_v23 = vmax.f32 %v1699_v20, 0.0  ;;  %v4282_v24 = vpop.f32.mrb[2].mxu0 }
 0x170   : > { %v1702_v26 = vadd.f32 %v4282_v24, %v5245_v16  ;;  %v1383_v27 = vpop.f32.mrb[3].mxu0 }
 0x171   : > { %v1701_v29 = vadd.f32 %v5245_v16, %v1383_v27  ;;  %4381 = vmatprep.mubr.msk.f32.mxu1 %vm1838_vm5, %v1763_v23 }
 0x172   : > { %4382 = vmatmul.mubr.msk.f32.vlgmr.msra.gmra.mrb[0].mxu1 %vm1838_vm5, %v1764_v25  ;;  %v1766_v32 = vmax.f32 %v1702_v26, 0.0 }
 0x173   : > { %v1765_v30 = vmax.f32 %v1701_v29, 0.0  ;;  %v4285_v31 = vpop.f32.mrb[4].mxu0  ;;  %4602 = vmatpush3.bf16.msra.mxu1 %v4599_v15 }
 0x174   : > { %v1704_v33 = vadd.f32 %v4285_v31, %v5245_v16  ;;  %v1393_v34 = vpop.f32.mrb[5].mxu0  ;;  %4604 = vmatprep.subr.bf16.mxu1 %v4603_v28 }
 0x175   : > { %v1703_v35 = vadd.f32 %v5245_v16, %v1393_v34  ;;  %4384 = vmatprep.mubr.msk.f32.mxu1 %vm1838_vm5, %v1765_v30 }
 0x176   : > { %4385 = vmatmul.mubr.msk.f32.gmra.mrb[2].mxu1 %vm1838_vm5, %v1766_v32  ;;  %v1768_v38 = vmax.f32 %v1704_v33, 0.0 }
 0x177   : > { %v1767_v36 = vmax.f32 %v1703_v35, 0.0  ;;  %v4288_v37 = vpop.f32.mrb[6].mxu0  ;;  %4606 = vmatpush3.bf16.msra.mxu1 %v4603_v28 }
 0x178   : > { %v1706_v39 = vadd.f32 %v4288_v37, %v5245_v16  ;;  %v1403_v40 = vpop.f32.mrb[7].mxu0 }
 0x179   : > { %v1705_v41 = vadd.f32 %v5245_v16, %v1403_v40  ;;  %4387 = vmatprep.mubr.msk.f32.mxu1 %vm1838_vm5, %v1767_v36 }
 0x17a   : > { %4388 = vmatmul.mubr.msk.f32.gmra.mrb[4].mxu1 %vm1838_vm5, %v1768_v38  ;;  %v1770_v44 = vmax.f32 %v1706_v39, 0.0 }
 0x17b   : > { %v1769_v42 = vmax.f32 %v1705_v41, 0.0  ;;  %v4291_v43 = vpop.f32.mrb[8].mxu0 }
 0x17c   : > { %v1708_v45 = vadd.f32 %v4291_v43, %v5245_v16  ;;  %v1413_v46 = vpop.f32.mrb[9].mxu0 }
 0x17d   : > { %v1707_v47 = vadd.f32 %v5245_v16, %v1413_v46  ;;  %4390 = vmatprep.mubr.msk.f32.mxu1 %vm1838_vm5, %v1769_v42 }
 0x17e   : > { %4391 = vmatmul.mubr.msk.f32.gmra.mrb[6].mxu1 %vm1838_vm5, %v1770_v44  ;;  %v1772_v50 = vmax.f32 %v1708_v45, 0.0 }
 0x17f   : > { %v1771_v48 = vmax.f32 %v1707_v47, 0.0  ;;  %v4294_v49 = vpop.f32.mrb[10].mxu0 }
 0x180   : > { %v1710_v51 = vadd.f32 %v4294_v49, %v5245_v16  ;;  %v1423_v52 = vpop.f32.mrb[11].mxu0 }
 0x181   : > { %v1709_v53 = vadd.f32 %v5245_v16, %v1423_v52  ;;  %4393 = vmatprep.mubr.msk.f32.mxu1 %vm1838_vm5, %v1771_v48 }
 0x182   : > { %4394 = vmatmul.mubr.msk.f32.gmra.mrb[8].mxu1 %vm1838_vm5, %v1772_v50  ;;  %v1774_v56 = vmax.f32 %v1710_v51, 0.0 }
 0x183   : > { %v1773_v54 = vmax.f32 %v1709_v53, 0.0  ;;  %v4297_v55 = vpop.f32.mrb[12].mxu0 }
 0x184   : > { %v1712_v57 = vadd.f32 %v4297_v55, %v5245_v16  ;;  %v1433_v58 = vpop.f32.mrb[13].mxu0 }
 0x185   : > { %v1711_v59 = vadd.f32 %v5245_v16, %v1433_v58  ;;  %4396 = vmatprep.mubr.msk.f32.mxu1 %vm1838_vm5, %v1773_v54 }
 0x186   : > { %4397 = vmatmul.mubr.msk.f32.gmra.mrb[10].mxu1 %vm1838_vm5, %v1774_v56  ;;  %v1776_v62 = vmax.f32 %v1712_v57, 0.0 }
 0x187   : > { %v1775_v60 = vmax.f32 %v1711_v59, 0.0  ;;  %v4300_v61 = vpop.f32.mrb[14].mxu0 }
 0x188   : > { %v1714_v63 = vadd.f32 %v4300_v61, %v5245_v16  ;;  %v1443_v0 = vpop.f32.mrb[15].mxu0 }
 0x189   : > { %v1713_v1 = vadd.f32 %v5245_v16, %v1443_v0  ;;  %4399 = vmatprep.mubr.msk.f32.mxu1 %vm1838_vm5, %v1775_v60 }
 0x18a   : > { %4400 = vmatmul.mubr.msk.f32.gmra.mrb[12].mxu1 %vm1838_vm5, %v1776_v62  ;;  %v1778_v4 = vmax.f32 %v1714_v63, 0.0 }
 0x18b   : > { %v1777_v2 = vmax.f32 %v1713_v1, 0.0  ;;  %v4303_v3 = vpop.f32.mrb[16].mxu0 }
 0x18c   : > { %v1716_v5 = vadd.f32 %v4303_v3, %v5245_v16  ;;  %v1453_v6 = vpop.f32.mrb[17].mxu0 }
 0x18d   : > { %v1715_v7 = vadd.f32 %v5245_v16, %v1453_v6  ;;  %4402 = vmatprep.mubr.msk.f32.mxu1 %vm1838_vm5, %v1777_v2 }
 0x18e   : > { %4403 = vmatmul.mubr.msk.f32.gmra.mrb[14].mxu1 %vm1838_vm5, %v1778_v4  ;;  %v1780_v10 = vmax.f32 %v1716_v5, 0.0 }
 0x18f   : > { %v1779_v8 = vmax.f32 %v1715_v7, 0.0  ;;  %v4306_v9 = vpop.f32.mrb[18].mxu0 }
 0x190   : > { %v1718_v11 = vadd.f32 %v4306_v9, %v5245_v16  ;;  %v1463_v12 = vpop.f32.mrb[19].mxu0 }
 0x191   : > { %v1717_v13 = vadd.f32 %v5245_v16, %v1463_v12  ;;  %4405 = vmatprep.mubr.msk.f32.mxu1 %vm1838_vm5, %v1779_v8 }
 0x192   : > { %4406 = vmatmul.mubr.msk.f32.gmra.mrb[16].mxu1 %vm1838_vm5, %v1780_v10  ;;  %v1782_v17 = vmax.f32 %v1718_v11, 0.0 }
 0x193   : > { %v1781_v14 = vmax.f32 %v1717_v13, 0.0  ;;  %v4309_v15 = vpop.f32.mrb[20].mxu0 }
 0x194   : > { %v1720_v18 = vadd.f32 %v4309_v15, %v5245_v16  ;;  %v1473_v19 = vpop.f32.mrb[21].mxu0 }
 0x195   : > { %v1719_v20 = vadd.f32 %v5245_v16, %v1473_v19  ;;  %4408 = vmatprep.mubr.msk.f32.mxu1 %vm1838_vm5, %v1781_v14 }
 0x196   : > { %4409 = vmatmul.mubr.msk.f32.gmra.mrb[18].mxu1 %vm1838_vm5, %v1782_v17  ;;  %v1784_v23 = vmax.f32 %v1720_v18, 0.0 }
 0x197   : > { %v1783_v21 = vmax.f32 %v1719_v20, 0.0  ;;  %v4312_v22 = vpop.f32.mrb[22].mxu0 }
 0x198   : > { %v1722_v24 = vadd.f32 %v4312_v22, %v5245_v16  ;;  %v1483_v25 = vpop.f32.mrb[23].mxu0 }
 0x199   : > { %v1721_v26 = vadd.f32 %v5245_v16, %v1483_v25  ;;  %4411 = vmatprep.mubr.msk.f32.mxu1 %vm1838_vm5, %v1783_v21 }
 0x19a   : > { %4412 = vmatmul.mubr.msk.f32.gmra.mrb[20].mxu1 %vm1838_vm5, %v1784_v23  ;;  %v1786_v29 = vmax.f32 %v1722_v24, 0.0 }
 0x19b   : > { %v1785_v27 = vmax.f32 %v1721_v26, 0.0  ;;  %v4315_v28 = vpop.f32.mrb[24].mxu0 }
 0x19c   : > { %v1724_v30 = vadd.f32 %v4315_v28, %v5245_v16  ;;  %v1493_v31 = vpop.f32.mrb[25].mxu0 }
 0x19d   : > { %v1723_v32 = vadd.f32 %v5245_v16, %v1493_v31  ;;  %4414 = vmatprep.mubr.msk.f32.mxu1 %vm1838_vm5, %v1785_v27 }
 0x19e   : > { %4415 = vmatmul.mubr.msk.f32.gmra.mrb[22].mxu1 %vm1838_vm5, %v1786_v29  ;;  %v1788_v35 = vmax.f32 %v1724_v30, 0.0 }
 0x19f   : > { %v1787_v33 = vmax.f32 %v1723_v32, 0.0  ;;  %v4318_v34 = vpop.f32.mrb[26].mxu0 }
 0x1a0   : > { %v1726_v36 = vadd.f32 %v4318_v34, %v5245_v16  ;;  %v1503_v37 = vpop.f32.mrb[27].mxu0 }
 0x1a1   : > { %v1725_v38 = vadd.f32 %v5245_v16, %v1503_v37  ;;  %4417 = vmatprep.mubr.msk.f32.mxu1 %vm1838_vm5, %v1787_v33 }
 0x1a2   : > { %4418 = vmatmul.mubr.msk.f32.gmra.mrb[24].mxu1 %vm1838_vm5, %v1788_v35  ;;  %v1790_v41 = vmax.f32 %v1726_v36, 0.0 }
 0x1a3   : > { %v1789_v39 = vmax.f32 %v1725_v38, 0.0  ;;  %v4321_v40 = vpop.f32.mrb[28].mxu0 }
 0x1a4   : > { %v1728_v42 = vadd.f32 %v4321_v40, %v5245_v16  ;;  %v1513_v43 = vpop.f32.mrb[29].mxu0 }
 0x1a5   : > { %v1727_v44 = vadd.f32 %v5245_v16, %v1513_v43  ;;  %4420 = vmatprep.mubr.msk.f32.mxu1 %vm1838_vm5, %v1789_v39 }
 0x1a6   : > { %4421 = vmatmul.mubr.msk.f32.gmra.mrb[26].mxu1 %vm1838_vm5, %v1790_v41  ;;  %v1792_v47 = vmax.f32 %v1728_v42, 0.0 }
 0x1a7   : > { %v1791_v45 = vmax.f32 %v1727_v44, 0.0  ;;  %v4324_v46 = vpop.f32.mrb[30].mxu0 }
 0x1a8   : > { %v1730_v48 = vadd.f32 %v4324_v46, %v5245_v16  ;;  %v1523_v49 = vpop.f32.mrb[31].mxu0 }
 0x1a9   : > { %v1729_v50 = vadd.f32 %v5245_v16, %v1523_v49  ;;  %4423 = vmatprep.mubr.msk.f32.mxu1 %vm1838_vm5, %v1791_v45 }
 0x1aa   : > { %4424 = vmatmul.mubr.msk.f32.gmra.mrb[28].mxu1 %vm1838_vm5, %v1792_v47  ;;  %v1794_v53 = vmax.f32 %v1730_v48, 0.0 }
 0x1ab   : > { %v1793_v51 = vmax.f32 %v1729_v50, 0.0  ;;  %v4327_v52 = vpop.f32.mrb[32].mxu0 }
 0x1ac   : > { %v1732_v54 = vadd.f32 %v4327_v52, %v5245_v16  ;;  %v1533_v55 = vpop.f32.mrb[33].mxu0 }
 0x1ad   : > { %v1731_v56 = vadd.f32 %v5245_v16, %v1533_v55  ;;  %4426 = vmatprep.mubr.msk.f32.mxu1 %vm1838_vm5, %v1793_v51 }
 0x1ae   : > { %4427 = vmatmul.mubr.msk.f32.gmra.mrb[30].mxu1 %vm1838_vm5, %v1794_v53  ;;  %v1796_v59 = vmax.f32 %v1732_v54, 0.0 }
 0x1af   : > { %v1795_v57 = vmax.f32 %v1731_v56, 0.0  ;;  %v4330_v58 = vpop.f32.mrb[34].mxu0 }
 0x1b0   : > { %v1734_v60 = vadd.f32 %v4330_v58, %v5245_v16  ;;  %v1543_v61 = vpop.f32.mrb[35].mxu0 }
 0x1b1   : > { %v1733_v62 = vadd.f32 %v5245_v16, %v1543_v61  ;;  %4429 = vmatprep.mubr.msk.f32.mxu1 %vm1838_vm5, %v1795_v57 }
 0x1b2   : > { %4430 = vmatmul.mubr.msk.f32.gmra.mrb[32].mxu1 %vm1838_vm5, %v1796_v59  ;;  %v1798_v1 = vmax.f32 %v1734_v60, 0.0 }
 0x1b3   : > { %v1797_v63 = vmax.f32 %v1733_v62, 0.0  ;;  %v4333_v0 = vpop.f32.mrb[36].mxu0 }
 0x1b4   : > { %v1736_v2 = vadd.f32 %v4333_v0, %v5245_v16  ;;  %v1553_v3 = vpop.f32.mrb[37].mxu0 }
 0x1b5   : > { %v1735_v4 = vadd.f32 %v5245_v16, %v1553_v3  ;;  %4432 = vmatprep.mubr.msk.f32.mxu1 %vm1838_vm5, %v1797_v63 }
 0x1b6   : > { %4433 = vmatmul.mubr.msk.f32.gmra.mrb[34].mxu1 %vm1838_vm5, %v1798_v1  ;;  %v1800_v7 = vmax.f32 %v1736_v2, 0.0 }
 0x1b7   : > { %v1799_v5 = vmax.f32 %v1735_v4, 0.0  ;;  %v4336_v6 = vpop.f32.mrb[38].mxu0 }
 0x1b8   : > { %v1738_v8 = vadd.f32 %v4336_v6, %v5245_v16  ;;  %v1563_v9 = vpop.f32.mrb[39].mxu0 }
 0x1b9   : > { %v1737_v10 = vadd.f32 %v5245_v16, %v1563_v9  ;;  %4435 = vmatprep.mubr.msk.f32.mxu1 %vm1838_vm5, %v1799_v5 }
 0x1ba   : > { %4436 = vmatmul.mubr.msk.f32.gmra.mrb[36].mxu1 %vm1838_vm5, %v1800_v7  ;;  %v1802_v13 = vmax.f32 %v1738_v8, 0.0 }
 0x1bb   : > { %v1801_v11 = vmax.f32 %v1737_v10, 0.0  ;;  %v4339_v12 = vpop.f32.mrb[40].mxu0 }
 0x1bc   : > { %v1740_v14 = vadd.f32 %v4339_v12, %v5245_v16  ;;  %v1573_v15 = vpop.f32.mrb[41].mxu0 }
 0x1bd   : > { %v1739_v17 = vadd.f32 %v5245_v16, %v1573_v15  ;;  %4438 = vmatprep.mubr.msk.f32.mxu1 %vm1838_vm5, %v1801_v11 }
 0x1be   : > { %4439 = vmatmul.mubr.msk.f32.gmra.mrb[38].mxu1 %vm1838_vm5, %v1802_v13  ;;  %v1804_v20 = vmax.f32 %v1740_v14, 0.0 }
 0x1bf   : > { %v1803_v18 = vmax.f32 %v1739_v17, 0.0  ;;  %v4342_v19 = vpop.f32.mrb[42].mxu0 }
 0x1c0   : > { %v1742_v21 = vadd.f32 %v4342_v19, %v5245_v16  ;;  %v1583_v22 = vpop.f32.mrb[43].mxu0 }
 0x1c1   : > { %v1741_v23 = vadd.f32 %v5245_v16, %v1583_v22  ;;  %4441 = vmatprep.mubr.msk.f32.mxu1 %vm1838_vm5, %v1803_v18 }
 0x1c2   : > { %4442 = vmatmul.mubr.msk.f32.gmra.mrb[40].mxu1 %vm1838_vm5, %v1804_v20  ;;  %v1806_v26 = vmax.f32 %v1742_v21, 0.0 }
 0x1c3   : > { %v1805_v24 = vmax.f32 %v1741_v23, 0.0  ;;  %v4345_v25 = vpop.f32.mrb[44].mxu0  ;;  %v5384_v23 = vld [vmem:[%s5926_s6] ss:$0 sm:$0xff] }
 0x1c4   : > { %v1744_v27 = vadd.f32 %v4345_v25, %v5245_v16  ;;  %v1593_v28 = vpop.f32.mrb[45].mxu0 }
 0x1c5   : > { %v1743_v29 = vadd.f32 %v5245_v16, %v1593_v28  ;;  %4444 = vmatprep.mubr.msk.f32.mxu1 %vm1838_vm5, %v1805_v24 }
 0x1c6   : > { %4445 = vmatmul.mubr.msk.f32.gmra.mrb[42].mxu1 %vm1838_vm5, %v1806_v26  ;;  %v1808_v32 = vmax.f32 %v1744_v27, 0.0 }
 0x1c7   : > { %v1807_v30 = vmax.f32 %v1743_v29, 0.0  ;;  %v4348_v31 = vpop.f32.mrb[46].mxu0 }
 0x1c8   : > { %v1746_v33 = vadd.f32 %v4348_v31, %v5245_v16  ;;  %v1603_v34 = vpop.f32.mrb[47].mxu0 }
 0x1c9   : > { %v1745_v35 = vadd.f32 %v5245_v16, %v1603_v34  ;;  %4447 = vmatprep.mubr.msk.f32.mxu1 %vm1838_vm5, %v1807_v30 }
 0x1ca   : > { %4448 = vmatmul.mubr.msk.f32.gmra.mrb[44].mxu1 %vm1838_vm5, %v1808_v32  ;;  %v1810_v38 = vmax.f32 %v1746_v33, 0.0 }
 0x1cb   : > { %v1809_v36 = vmax.f32 %v1745_v35, 0.0  ;;  %v4351_v37 = vpop.f32.mrb[48].mxu0 }
 0x1cc   : > { %v1748_v39 = vadd.f32 %v4351_v37, %v5245_v16  ;;  %v1613_v40 = vpop.f32.mrb[49].mxu0 }
 0x1cd   : > { %v1747_v41 = vadd.f32 %v5245_v16, %v1613_v40  ;;  %4450 = vmatprep.mubr.msk.f32.mxu1 %vm1838_vm5, %v1809_v36 }
 0x1ce   : > { %4451 = vmatmul.mubr.msk.f32.gmra.mrb[46].mxu1 %vm1838_vm5, %v1810_v38  ;;  %v1812_v44 = vmax.f32 %v1748_v39, 0.0 }
 0x1cf   : > { %v1811_v42 = vmax.f32 %v1747_v41, 0.0  ;;  %v4354_v43 = vpop.f32.mrb[50].mxu0 }
 0x1d0   : > { %v1750_v45 = vadd.f32 %v4354_v43, %v5245_v16  ;;  %v1623_v46 = vpop.f32.mrb[51].mxu0 }
 0x1d1   : > { %v1749_v47 = vadd.f32 %v5245_v16, %v1623_v46  ;;  %4453 = vmatprep.mubr.msk.f32.mxu1 %vm1838_vm5, %v1811_v42 }
 0x1d2   : > { %4454 = vmatmul.mubr.msk.f32.gmra.mrb[48].mxu1 %vm1838_vm5, %v1812_v44  ;;  %v1814_v50 = vmax.f32 %v1750_v45, 0.0 }
 0x1d3   : > { %v1813_v48 = vmax.f32 %v1749_v47, 0.0  ;;  %v4357_v49 = vpop.f32.mrb[52].mxu0 }
 0x1d4   : > { %v1752_v51 = vadd.f32 %v4357_v49, %v5245_v16  ;;  %v1633_v52 = vpop.f32.mrb[53].mxu0 }
 0x1d5   : > { %v1751_v53 = vadd.f32 %v5245_v16, %v1633_v52  ;;  %4456 = vmatprep.mubr.msk.f32.mxu1 %vm1838_vm5, %v1813_v48 }
 0x1d6   : > { %4457 = vmatmul.mubr.msk.f32.gmra.mrb[50].mxu1 %vm1838_vm5, %v1814_v50  ;;  %v1816_v56 = vmax.f32 %v1752_v51, 0.0 }
 0x1d7   : > { %v1815_v54 = vmax.f32 %v1751_v53, 0.0  ;;  %v4360_v55 = vpop.f32.mrb[54].mxu0 }
 0x1d8   : > { %v1754_v57 = vadd.f32 %v4360_v55, %v5245_v16  ;;  %v1643_v58 = vpop.f32.mrb[55].mxu0 }
 0x1d9   : > { %v1753_v59 = vadd.f32 %v5245_v16, %v1643_v58  ;;  %4459 = vmatprep.mubr.msk.f32.mxu1 %vm1838_vm5, %v1815_v54 }
 0x1da   : > { %4460 = vmatmul.mubr.msk.f32.gmra.mrb[52].mxu1 %vm1838_vm5, %v1816_v56  ;;  %v1818_v62 = vmax.f32 %v1754_v57, 0.0 }
 0x1db   : > { %v1817_v60 = vmax.f32 %v1753_v59, 0.0  ;;  %v4363_v61 = vpop.f32.mrb[56].mxu0 }
 0x1dc   : > { %v1756_v63 = vadd.f32 %v4363_v61, %v5245_v16  ;;  %v1653_v0 = vpop.f32.mrb[57].mxu0 }
 0x1dd   : > { %v1755_v1 = vadd.f32 %v5245_v16, %v1653_v0  ;;  %4462 = vmatprep.mubr.msk.f32.mxu1 %vm1838_vm5, %v1817_v60 }
 0x1de   : > { %4463 = vmatmul.mubr.msk.f32.gmra.mrb[54].mxu1 %vm1838_vm5, %v1818_v62  ;;  %v1820_v4 = vmax.f32 %v1756_v63, 0.0 }
 0x1df   : > { %v1819_v2 = vmax.f32 %v1755_v1, 0.0  ;;  %v4366_v3 = vpop.f32.mrb[58].mxu0 }
 0x1e0   : > { %v1758_v5 = vadd.f32 %v4366_v3, %v5245_v16  ;;  %v1663_v6 = vpop.f32.mrb[59].mxu0 }
 0x1e1   : > { %v1757_v7 = vadd.f32 %v5245_v16, %v1663_v6  ;;  %4465 = vmatprep.mubr.msk.f32.mxu1 %vm1838_vm5, %v1819_v2 }
 0x1e2   : > { %4466 = vmatmul.mubr.msk.f32.gmra.mrb[56].mxu1 %vm1838_vm5, %v1820_v4  ;;  %v1822_v10 = vmax.f32 %v1758_v5, 0.0 }
 0x1e3   : > { %v1821_v8 = vmax.f32 %v1757_v7, 0.0  ;;  %v4369_v9 = vpop.f32.mrb[60].mxu0 }
 0x1e4   : > { %v1760_v11 = vadd.f32 %v4369_v9, %v5245_v16  ;;  %v1673_v12 = vpop.f32.mrb[61].mxu0 }
 0x1e5   : > { %v1759_v13 = vadd.f32 %v5245_v16, %v1673_v12  ;;  %4468 = vmatprep.mubr.msk.f32.mxu1 %vm1838_vm5, %v1821_v8 }
 0x1e6   : > { %4469 = vmatmul.mubr.msk.f32.gmra.mrb[58].mxu1 %vm1838_vm5, %v1822_v10  ;;  %v1824_v17 = vmax.f32 %v1760_v11, 0.0 }
 0x1e7   : > { %v1823_v14 = vmax.f32 %v1759_v13, 0.0  ;;  %v4372_v15 = vpop.f32.mrb[62].mxu0 }
 0x1e8   : > { %v1762_v18 = vadd.f32 %v4372_v15, %v5245_v16  ;;  %v1683_v19 = vpop.f32.mrb[63].mxu0 }
 0x1e9   : > { %v1761_v20 = vadd.f32 %v5245_v16, %v1683_v19  ;;  %4471 = vmatprep.mubr.msk.f32.mxu1 %vm1838_vm5, %v1823_v14 }
 0x1ea   : > { %4472 = vmatmul.mubr.msk.f32.gmra.mrb[60].mxu1 %vm1838_vm5, %v1824_v17  ;;  %v1826_v22 = vmax.f32 %v1762_v18, 0.0 }
 0x1eb   : > { %v1825_v21 = vmax.f32 %v1761_v20, 0.0 }
 0x1ed   : > { %4474 = vmatprep.mubr.msk.f32.mxu1 %vm1838_vm5, %v1825_v21 }
 0x1ee   : > { %4475 = vmatmul.mubr.msk.f32.gmra.mrb[62].mxu1 %vm1838_vm5, %v1826_v22 }
 0x245   : > { %v4383_v24 = vpop.f32.mrb[0].mxu1 }
 0x246   : > { %v2103_v25 = vadd.f32 %v4383_v24, %v5384_v23  ;;  %v2097_v26 = vpop.f32.mrb[1].mxu1 }
 0x247   : > { %v2098_v16 = vadd.f32 %v5384_v23, %v2097_v26 }
 0x248   : > { %v2417_v29 = vmax.f32 %v2103_v25, 0.0 }
 0x249   : > { %v2416_v27 = vmax.f32 %v2098_v16, 0.0  ;;  %v4386_v28 = vpop.f32.mrb[2].mxu1 }
 0x24a   : > { %v2113_v30 = vadd.f32 %v4386_v28, %v5384_v23  ;;  %v2107_v31 = vpop.f32.mrb[3].mxu1 }
 0x24b   : > { %v2108_v32 = vadd.f32 %v5384_v23, %v2107_v31  ;;  %4485 = vmatprep.mubr.msk.f32.mxu1 %vm1838_vm5, %v2416_v27 }
 0x24c   : > { %4486 = vmatmul.mubr.msk.f32.vlgmr.msra.gmra.mrb[64].mxu1 %vm1838_vm5, %v2417_v29  ;;  %v2419_v35 = vmax.f32 %v2113_v30, 0.0 }
 0x24d   : > { %v2418_v33 = vmax.f32 %v2108_v32, 0.0  ;;  %v4389_v34 = vpop.f32.mrb[4].mxu1 }
 0x24e   : > { %v2123_v36 = vadd.f32 %v4389_v34, %v5384_v23  ;;  %v2117_v37 = vpop.f32.mrb[5].mxu1 }
 0x24f   : > { %v2118_v38 = vadd.f32 %v5384_v23, %v2117_v37  ;;  %4488 = vmatprep.mubr.msk.f32.mxu1 %vm1838_vm5, %v2418_v33 }
 0x250   : > { %4489 = vmatmul.mubr.msk.f32.gmra.mrb[66].mxu1 %vm1838_vm5, %v2419_v35  ;;  %v2421_v41 = vmax.f32 %v2123_v36, 0.0 }
 0x251   : > { %v2420_v39 = vmax.f32 %v2118_v38, 0.0  ;;  %v4392_v40 = vpop.f32.mrb[6].mxu1 }
 0x252   : > { %v2133_v42 = vadd.f32 %v4392_v40, %v5384_v23  ;;  %v2127_v43 = vpop.f32.mrb[7].mxu1 }
 0x253   : > { %v2128_v44 = vadd.f32 %v5384_v23, %v2127_v43  ;;  %4491 = vmatprep.mubr.msk.f32.mxu1 %vm1838_vm5, %v2420_v39 }
 0x254   : > { %4492 = vmatmul.mubr.msk.f32.gmra.mrb[68].mxu1 %vm1838_vm5, %v2421_v41  ;;  %v2423_v47 = vmax.f32 %v2133_v42, 0.0 }
 0x255   : > { %v2422_v45 = vmax.f32 %v2128_v44, 0.0  ;;  %v4395_v46 = vpop.f32.mrb[8].mxu1 }
 0x256   : > { %v2143_v48 = vadd.f32 %v4395_v46, %v5384_v23  ;;  %v2137_v49 = vpop.f32.mrb[9].mxu1 }
 0x257   : > { %v2138_v50 = vadd.f32 %v5384_v23, %v2137_v49  ;;  %4494 = vmatprep.mubr.msk.f32.mxu1 %vm1838_vm5, %v2422_v45 }
 0x258   : > { %4495 = vmatmul.mubr.msk.f32.gmra.mrb[70].mxu1 %vm1838_vm5, %v2423_v47  ;;  %v2425_v53 = vmax.f32 %v2143_v48, 0.0 }
 0x259   : > { %v2424_v51 = vmax.f32 %v2138_v50, 0.0  ;;  %v4398_v52 = vpop.f32.mrb[10].mxu1 }
 0x25a   : > { %v2153_v54 = vadd.f32 %v4398_v52, %v5384_v23  ;;  %v2147_v55 = vpop.f32.mrb[11].mxu1 }
 0x25b   : > { %v2148_v56 = vadd.f32 %v5384_v23, %v2147_v55  ;;  %4497 = vmatprep.mubr.msk.f32.mxu1 %vm1838_vm5, %v2424_v51 }
 0x25c   : > { %4498 = vmatmul.mubr.msk.f32.gmra.mrb[72].mxu1 %vm1838_vm5, %v2425_v53  ;;  %v2427_v59 = vmax.f32 %v2153_v54, 0.0 }
 0x25d   : > { %v2426_v57 = vmax.f32 %v2148_v56, 0.0  ;;  %v4401_v58 = vpop.f32.mrb[12].mxu1 }
 0x25e   : > { %v2163_v60 = vadd.f32 %v4401_v58, %v5384_v23  ;;  %v2157_v61 = vpop.f32.mrb[13].mxu1 }
 0x25f   : > { %v2158_v62 = vadd.f32 %v5384_v23, %v2157_v61  ;;  %4500 = vmatprep.mubr.msk.f32.mxu1 %vm1838_vm5, %v2426_v57 }
 0x260   : > { %4501 = vmatmul.mubr.msk.f32.gmra.mrb[74].mxu1 %vm1838_vm5, %v2427_v59  ;;  %v2429_v1 = vmax.f32 %v2163_v60, 0.0 }
 0x261   : > { %v2428_v63 = vmax.f32 %v2158_v62, 0.0  ;;  %v4404_v0 = vpop.f32.mrb[14].mxu1 }
 0x262   : > { %v2173_v2 = vadd.f32 %v4404_v0, %v5384_v23  ;;  %v2167_v3 = vpop.f32.mrb[15].mxu1 }
 0x263   : > { %v2168_v4 = vadd.f32 %v5384_v23, %v2167_v3  ;;  %4503 = vmatprep.mubr.msk.f32.mxu1 %vm1838_vm5, %v2428_v63 }
 0x264   : > { %4504 = vmatmul.mubr.msk.f32.gmra.mrb[76].mxu1 %vm1838_vm5, %v2429_v1  ;;  %v2431_v7 = vmax.f32 %v2173_v2, 0.0 }
 0x265   : > { %v2430_v5 = vmax.f32 %v2168_v4, 0.0  ;;  %v4407_v6 = vpop.f32.mrb[16].mxu1 }
 0x266   : > { %v2183_v8 = vadd.f32 %v4407_v6, %v5384_v23  ;;  %v2177_v9 = vpop.f32.mrb[17].mxu1 }
 0x267   : > { %v2178_v10 = vadd.f32 %v5384_v23, %v2177_v9  ;;  %4506 = vmatprep.mubr.msk.f32.mxu1 %vm1838_vm5, %v2430_v5 }
 0x268   : > { %4507 = vmatmul.mubr.msk.f32.gmra.mrb[78].mxu1 %vm1838_vm5, %v2431_v7  ;;  %v2433_v13 = vmax.f32 %v2183_v8, 0.0 }
 0x269   : > { %v2432_v11 = vmax.f32 %v2178_v10, 0.0  ;;  %v4410_v12 = vpop.f32.mrb[18].mxu1 }
 0x26a   : > { %v2193_v14 = vadd.f32 %v4410_v12, %v5384_v23  ;;  %v2187_v15 = vpop.f32.mrb[19].mxu1 }
 0x26b   : > { %v2188_v17 = vadd.f32 %v5384_v23, %v2187_v15  ;;  %4509 = vmatprep.mubr.msk.f32.mxu1 %vm1838_vm5, %v2432_v11 }
 0x26c   : > { %4510 = vmatmul.mubr.msk.f32.gmra.mrb[80].mxu1 %vm1838_vm5, %v2433_v13  ;;  %v2435_v20 = vmax.f32 %v2193_v14, 0.0 }
 0x26d   : > { %v2434_v18 = vmax.f32 %v2188_v17, 0.0  ;;  %v4413_v19 = vpop.f32.mrb[20].mxu1 }
 0x26e   : > { %v2203_v21 = vadd.f32 %v4413_v19, %v5384_v23  ;;  %v2197_v22 = vpop.f32.mrb[21].mxu1 }
 0x26f   : > { %v2198_v24 = vadd.f32 %v5384_v23, %v2197_v22  ;;  %4512 = vmatprep.mubr.msk.f32.mxu1 %vm1838_vm5, %v2434_v18 }
 0x270   : > { %4513 = vmatmul.mubr.msk.f32.gmra.mrb[82].mxu1 %vm1838_vm5, %v2435_v20  ;;  %v2437_v16 = vmax.f32 %v2203_v21, 0.0 }
 0x271   : > { %v2436_v25 = vmax.f32 %v2198_v24, 0.0  ;;  %v4416_v26 = vpop.f32.mrb[22].mxu1 }
 0x272   : > { %v2213_v27 = vadd.f32 %v4416_v26, %v5384_v23  ;;  %v2207_v28 = vpop.f32.mrb[23].mxu1 }
 0x273   : > { %v2208_v29 = vadd.f32 %v5384_v23, %v2207_v28  ;;  %4515 = vmatprep.mubr.msk.f32.mxu1 %vm1838_vm5, %v2436_v25 }
 0x274   : > { %4516 = vmatmul.mubr.msk.f32.gmra.mrb[84].mxu1 %vm1838_vm5, %v2437_v16  ;;  %v2439_v32 = vmax.f32 %v2213_v27, 0.0 }
 0x275   : > { %v2438_v30 = vmax.f32 %v2208_v29, 0.0  ;;  %v4419_v31 = vpop.f32.mrb[24].mxu1 }
 0x276   : > { %v2223_v33 = vadd.f32 %v4419_v31, %v5384_v23  ;;  %v2217_v34 = vpop.f32.mrb[25].mxu1 }
 0x277   : > { %v2218_v35 = vadd.f32 %v5384_v23, %v2217_v34  ;;  %4518 = vmatprep.mubr.msk.f32.mxu1 %vm1838_vm5, %v2438_v30 }
 0x278   : > { %4519 = vmatmul.mubr.msk.f32.gmra.mrb[86].mxu1 %vm1838_vm5, %v2439_v32  ;;  %v2441_v38 = vmax.f32 %v2223_v33, 0.0 }
 0x279   : > { %v2440_v36 = vmax.f32 %v2218_v35, 0.0  ;;  %v4422_v37 = vpop.f32.mrb[26].mxu1 }
 0x27a   : > { %v2233_v39 = vadd.f32 %v4422_v37, %v5384_v23  ;;  %v2227_v40 = vpop.f32.mrb[27].mxu1 }
 0x27b   : > { %v2228_v41 = vadd.f32 %v5384_v23, %v2227_v40  ;;  %4521 = vmatprep.mubr.msk.f32.mxu1 %vm1838_vm5, %v2440_v36 }
 0x27c   : > { %4522 = vmatmul.mubr.msk.f32.gmra.mrb[88].mxu1 %vm1838_vm5, %v2441_v38  ;;  %v2443_v44 = vmax.f32 %v2233_v39, 0.0 }
 0x27d   : > { %v2442_v42 = vmax.f32 %v2228_v41, 0.0  ;;  %v4425_v43 = vpop.f32.mrb[28].mxu1 }
 0x27e   : > { %v2243_v45 = vadd.f32 %v4425_v43, %v5384_v23  ;;  %v2237_v46 = vpop.f32.mrb[29].mxu1 }
 0x27f   : > { %v2238_v47 = vadd.f32 %v5384_v23, %v2237_v46  ;;  %4524 = vmatprep.mubr.msk.f32.mxu1 %vm1838_vm5, %v2442_v42 }
 0x280   : > { %4525 = vmatmul.mubr.msk.f32.gmra.mrb[90].mxu1 %vm1838_vm5, %v2443_v44  ;;  %v2445_v50 = vmax.f32 %v2243_v45, 0.0 }
 0x281   : > { %v2444_v48 = vmax.f32 %v2238_v47, 0.0  ;;  %v4428_v49 = vpop.f32.mrb[30].mxu1 }
 0x282   : > { %v2253_v51 = vadd.f32 %v4428_v49, %v5384_v23  ;;  %v2247_v52 = vpop.f32.mrb[31].mxu1 }
 0x283   : > { %v2248_v53 = vadd.f32 %v5384_v23, %v2247_v52  ;;  %4527 = vmatprep.mubr.msk.f32.mxu1 %vm1838_vm5, %v2444_v48 }
 0x284   : > { %4528 = vmatmul.mubr.msk.f32.gmra.mrb[92].mxu1 %vm1838_vm5, %v2445_v50  ;;  %v2447_v56 = vmax.f32 %v2253_v51, 0.0 }
 0x285   : > { %v2446_v54 = vmax.f32 %v2248_v53, 0.0  ;;  %v4431_v55 = vpop.f32.mrb[32].mxu1 }
 0x286   : > { %v2263_v57 = vadd.f32 %v4431_v55, %v5384_v23  ;;  %v2257_v58 = vpop.f32.mrb[33].mxu1 }
 0x287   : > { %v2258_v59 = vadd.f32 %v5384_v23, %v2257_v58  ;;  %4530 = vmatprep.mubr.msk.f32.mxu1 %vm1838_vm5, %v2446_v54 }
 0x288   : > { %4531 = vmatmul.mubr.msk.f32.gmra.mrb[94].mxu1 %vm1838_vm5, %v2447_v56  ;;  %v2449_v62 = vmax.f32 %v2263_v57, 0.0 }
 0x289   : > { %v2448_v60 = vmax.f32 %v2258_v59, 0.0  ;;  %v4434_v61 = vpop.f32.mrb[34].mxu1 }
 0x28a   : > { %v2273_v63 = vadd.f32 %v4434_v61, %v5384_v23  ;;  %v2267_v0 = vpop.f32.mrb[35].mxu1 }
 0x28b   : > { %v2268_v1 = vadd.f32 %v5384_v23, %v2267_v0  ;;  %4533 = vmatprep.mubr.msk.f32.mxu1 %vm1838_vm5, %v2448_v60 }
 0x28c   : > { %4534 = vmatmul.mubr.msk.f32.gmra.mrb[96].mxu1 %vm1838_vm5, %v2449_v62  ;;  %v2451_v4 = vmax.f32 %v2273_v63, 0.0 }
 0x28d   : > { %v2450_v2 = vmax.f32 %v2268_v1, 0.0  ;;  %v4437_v3 = vpop.f32.mrb[36].mxu1 }
 0x28e   : > { %v2283_v5 = vadd.f32 %v4437_v3, %v5384_v23  ;;  %v2277_v6 = vpop.f32.mrb[37].mxu1 }
 0x28f   : > { %v2278_v7 = vadd.f32 %v5384_v23, %v2277_v6  ;;  %4536 = vmatprep.mubr.msk.f32.mxu1 %vm1838_vm5, %v2450_v2 }
 0x290   : > { %4537 = vmatmul.mubr.msk.f32.gmra.mrb[98].mxu1 %vm1838_vm5, %v2451_v4  ;;  %v2453_v10 = vmax.f32 %v2283_v5, 0.0 }
 0x291   : > { %v2452_v8 = vmax.f32 %v2278_v7, 0.0  ;;  %v4440_v9 = vpop.f32.mrb[38].mxu1 }
 0x292   : > { %v2293_v11 = vadd.f32 %v4440_v9, %v5384_v23  ;;  %v2287_v12 = vpop.f32.mrb[39].mxu1 }
 0x293   : > { %v2288_v13 = vadd.f32 %v5384_v23, %v2287_v12  ;;  %4539 = vmatprep.mubr.msk.f32.mxu1 %vm1838_vm5, %v2452_v8 }
 0x294   : > { %4540 = vmatmul.mubr.msk.f32.gmra.mrb[100].mxu1 %vm1838_vm5, %v2453_v10  ;;  %v2455_v17 = vmax.f32 %v2293_v11, 0.0 }
 0x295   : > { %v2454_v14 = vmax.f32 %v2288_v13, 0.0  ;;  %v4443_v15 = vpop.f32.mrb[40].mxu1 }
 0x296   : > { %v2303_v18 = vadd.f32 %v4443_v15, %v5384_v23  ;;  %v2297_v19 = vpop.f32.mrb[41].mxu1 }
 0x297   : > { %v2298_v20 = vadd.f32 %v5384_v23, %v2297_v19  ;;  %4542 = vmatprep.mubr.msk.f32.mxu1 %vm1838_vm5, %v2454_v14 }
 0x298   : > { %4543 = vmatmul.mubr.msk.f32.gmra.mrb[102].mxu1 %vm1838_vm5, %v2455_v17  ;;  %v2457_v24 = vmax.f32 %v2303_v18, 0.0 }
 0x299   : > { %v2456_v21 = vmax.f32 %v2298_v20, 0.0  ;;  %v4446_v22 = vpop.f32.mrb[42].mxu1 }
 0x29a   : > { %v2313_v25 = vadd.f32 %v4446_v22, %v5384_v23  ;;  %v2307_v26 = vpop.f32.mrb[43].mxu1 }
 0x29b   : > { %v2308_v16 = vadd.f32 %v5384_v23, %v2307_v26  ;;  %4545 = vmatprep.mubr.msk.f32.mxu1 %vm1838_vm5, %v2456_v21 }
 0x29c   : > { %4546 = vmatmul.mubr.msk.f32.gmra.mrb[104].mxu1 %vm1838_vm5, %v2457_v24  ;;  %v2459_v29 = vmax.f32 %v2313_v25, 0.0 }
 0x29d   : > { %v2458_v27 = vmax.f32 %v2308_v16, 0.0  ;;  %v4449_v28 = vpop.f32.mrb[44].mxu1  ;;  %v5518_v16 = vld [vmem:[%s5928_s8] ss:$0 sm:$0xff] }
 0x29e   : > { %v2323_v30 = vadd.f32 %v4449_v28, %v5384_v23  ;;  %v2317_v31 = vpop.f32.mrb[45].mxu1 }
 0x29f   : > { %v2318_v32 = vadd.f32 %v5384_v23, %v2317_v31  ;;  %4548 = vmatprep.mubr.msk.f32.mxu1 %vm1838_vm5, %v2458_v27 }
 0x2a0   : > { %4549 = vmatmul.mubr.msk.f32.gmra.mrb[106].mxu1 %vm1838_vm5, %v2459_v29  ;;  %v2461_v35 = vmax.f32 %v2323_v30, 0.0 }
 0x2a1   : > { %v2460_v33 = vmax.f32 %v2318_v32, 0.0  ;;  %v4452_v34 = vpop.f32.mrb[46].mxu1 }
 0x2a2   : > { %v2333_v36 = vadd.f32 %v4452_v34, %v5384_v23  ;;  %v2327_v37 = vpop.f32.mrb[47].mxu1 }
 0x2a3   : > { %v2328_v38 = vadd.f32 %v5384_v23, %v2327_v37  ;;  %4551 = vmatprep.mubr.msk.f32.mxu1 %vm1838_vm5, %v2460_v33 }
 0x2a4   : > { %4552 = vmatmul.mubr.msk.f32.gmra.mrb[108].mxu1 %vm1838_vm5, %v2461_v35  ;;  %v2463_v41 = vmax.f32 %v2333_v36, 0.0 }
 0x2a5   : > { %v2462_v39 = vmax.f32 %v2328_v38, 0.0  ;;  %v4455_v40 = vpop.f32.mrb[48].mxu1 }
 0x2a6   : > { %v2343_v42 = vadd.f32 %v4455_v40, %v5384_v23  ;;  %v2337_v43 = vpop.f32.mrb[49].mxu1 }
 0x2a7   : > { %v2338_v44 = vadd.f32 %v5384_v23, %v2337_v43  ;;  %4554 = vmatprep.mubr.msk.f32.mxu1 %vm1838_vm5, %v2462_v39 }
 0x2a8   : > { %4555 = vmatmul.mubr.msk.f32.gmra.mrb[110].mxu1 %vm1838_vm5, %v2463_v41  ;;  %v2465_v47 = vmax.f32 %v2343_v42, 0.0 }
 0x2a9   : > { %v2464_v45 = vmax.f32 %v2338_v44, 0.0  ;;  %v4458_v46 = vpop.f32.mrb[50].mxu1 }
 0x2aa   : > { %v2353_v48 = vadd.f32 %v4458_v46, %v5384_v23  ;;  %v2347_v49 = vpop.f32.mrb[51].mxu1 }
 0x2ab   : > { %v2348_v50 = vadd.f32 %v5384_v23, %v2347_v49  ;;  %4557 = vmatprep.mubr.msk.f32.mxu1 %vm1838_vm5, %v2464_v45 }
 0x2ac   : > { %4558 = vmatmul.mubr.msk.f32.gmra.mrb[112].mxu1 %vm1838_vm5, %v2465_v47  ;;  %v2467_v53 = vmax.f32 %v2353_v48, 0.0 }
 0x2ad   : > { %v2466_v51 = vmax.f32 %v2348_v50, 0.0  ;;  %v4461_v52 = vpop.f32.mrb[52].mxu1 }
 0x2ae   : > { %v2363_v54 = vadd.f32 %v4461_v52, %v5384_v23  ;;  %v2357_v55 = vpop.f32.mrb[53].mxu1 }
 0x2af   : > { %v2358_v56 = vadd.f32 %v5384_v23, %v2357_v55  ;;  %4560 = vmatprep.mubr.msk.f32.mxu1 %vm1838_vm5, %v2466_v51 }
 0x2b0   : > { %4561 = vmatmul.mubr.msk.f32.gmra.mrb[114].mxu1 %vm1838_vm5, %v2467_v53  ;;  %v2469_v59 = vmax.f32 %v2363_v54, 0.0 }
 0x2b1   : > { %v2468_v57 = vmax.f32 %v2358_v56, 0.0  ;;  %v4464_v58 = vpop.f32.mrb[54].mxu1 }
 0x2b2   : > { %v2373_v60 = vadd.f32 %v4464_v58, %v5384_v23  ;;  %v2367_v61 = vpop.f32.mrb[55].mxu1 }
 0x2b3   : > { %v2368_v62 = vadd.f32 %v5384_v23, %v2367_v61  ;;  %4563 = vmatprep.mubr.msk.f32.mxu1 %vm1838_vm5, %v2468_v57 }
 0x2b4   : > { %4564 = vmatmul.mubr.msk.f32.gmra.mrb[116].mxu1 %vm1838_vm5, %v2469_v59  ;;  %v2471_v1 = vmax.f32 %v2373_v60, 0.0 }
 0x2b5   : > { %v2470_v63 = vmax.f32 %v2368_v62, 0.0  ;;  %v4467_v0 = vpop.f32.mrb[56].mxu1 }
 0x2b6   : > { %v2383_v2 = vadd.f32 %v4467_v0, %v5384_v23  ;;  %v2377_v3 = vpop.f32.mrb[57].mxu1 }
 0x2b7   : > { %v2378_v4 = vadd.f32 %v5384_v23, %v2377_v3  ;;  %4566 = vmatprep.mubr.msk.f32.mxu1 %vm1838_vm5, %v2470_v63 }
 0x2b8   : > { %4567 = vmatmul.mubr.msk.f32.gmra.mrb[118].mxu1 %vm1838_vm5, %v2471_v1  ;;  %v2473_v7 = vmax.f32 %v2383_v2, 0.0 }
 0x2b9   : > { %v2472_v5 = vmax.f32 %v2378_v4, 0.0  ;;  %v4470_v6 = vpop.f32.mrb[58].mxu1 }
 0x2ba   : > { %v2393_v8 = vadd.f32 %v4470_v6, %v5384_v23  ;;  %v2387_v9 = vpop.f32.mrb[59].mxu1 }
 0x2bb   : > { %v2388_v10 = vadd.f32 %v5384_v23, %v2387_v9  ;;  %4569 = vmatprep.mubr.msk.f32.mxu1 %vm1838_vm5, %v2472_v5 }
 0x2bc   : > { %4570 = vmatmul.mubr.msk.f32.gmra.mrb[120].mxu1 %vm1838_vm5, %v2473_v7  ;;  %v2475_v13 = vmax.f32 %v2393_v8, 0.0 }
 0x2bd   : > { %v2474_v11 = vmax.f32 %v2388_v10, 0.0  ;;  %v4473_v12 = vpop.f32.mrb[60].mxu1 }
 0x2be   : > { %v2403_v14 = vadd.f32 %v4473_v12, %v5384_v23  ;;  %v2397_v15 = vpop.f32.mrb[61].mxu1 }
 0x2bf   : > { %v2398_v17 = vadd.f32 %v5384_v23, %v2397_v15  ;;  %4572 = vmatprep.mubr.msk.f32.mxu1 %vm1838_vm5, %v2474_v11 }
 0x2c0   : > { %4573 = vmatmul.mubr.msk.f32.gmra.mrb[122].mxu1 %vm1838_vm5, %v2475_v13  ;;  %v2477_v20 = vmax.f32 %v2403_v14, 0.0 }
 0x2c1   : > { %v2476_v18 = vmax.f32 %v2398_v17, 0.0  ;;  %v4476_v19 = vpop.f32.mrb[62].mxu1 }
 0x2c2   : > { %v2413_v21 = vadd.f32 %v4476_v19, %v5384_v23  ;;  %v2407_v22 = vpop.f32.mrb[63].mxu1 }
 0x2c3   : > { %v2408_v24 = vadd.f32 %v5384_v23, %v2407_v22  ;;  %4575 = vmatprep.mubr.msk.f32.mxu1 %vm1838_vm5, %v2476_v18 }
 0x2c4   : > { %4576 = vmatmul.mubr.msk.f32.gmra.mrb[124].mxu1 %vm1838_vm5, %v2477_v20  ;;  %v2479_v26 = vmax.f32 %v2413_v21, 0.0 }
 0x2c5   : > { %v2478_v25 = vmax.f32 %v2408_v24, 0.0 }
 0x2c7   : > { %4578 = vmatprep.mubr.msk.f32.mxu1 %vm1838_vm5, %v2478_v25 }
 0x2c8   : > { %4579 = vmatmul.mubr.msk.f32.gmra.mrb[126].mxu1 %vm1838_vm5, %v2479_v26 }
 0x31f   : > { %v4487_v27 = vpop.f32.mrb[64].mxu1 }
 0x320   : > { %v2755_v23 = vadd.f32 %v4487_v27, %v5518_v16  ;;  %v2749_v28 = vpop.f32.mrb[65].mxu1 }
 0x321   : > { %v2750_v29 = vadd.f32 %v5518_v16, %v2749_v28 }
 0x322   : > { %3070 = vst.msk [vmem:[%s5522_s18 + $0x8] sm:$0xff] %vm3068_vm6, %v2755_v23 }
 0x323   : > { %3069 = vst.msk [vmem:[%s5522_s18] sm:$0xff] %vm3068_vm6, %v2750_v29  ;;  %v4490_v30 = vpop.f32.mrb[66].mxu1 }
 0x324   : > { %v2765_v31 = vadd.f32 %v4490_v30, %v5518_v16  ;;  %v2759_v32 = vpop.f32.mrb[67].mxu1 }
 0x325   : > { %v2760_v33 = vadd.f32 %v5518_v16, %v2759_v32 }
 0x326   : > { %3072 = vst.msk [vmem:[%s5522_s18 + $0x18] sm:$0xff] %vm3068_vm6, %v2765_v31 }
 0x327   : > { %3071 = vst.msk [vmem:[%s5522_s18 + $0x10] sm:$0xff] %vm3068_vm6, %v2760_v33  ;;  %v4493_v34 = vpop.f32.mrb[68].mxu1 }
 0x328   : > { %v2775_v35 = vadd.f32 %v4493_v34, %v5518_v16  ;;  %v2769_v36 = vpop.f32.mrb[69].mxu1 }
 0x329   : > { %v2770_v37 = vadd.f32 %v5518_v16, %v2769_v36 }
 0x32a   : > { %3074 = vst.msk [vmem:[%s5522_s18 + $0x28] sm:$0xff] %vm3068_vm6, %v2775_v35 }
 0x32b   : > { %3073 = vst.msk [vmem:[%s5522_s18 + $0x20] sm:$0xff] %vm3068_vm6, %v2770_v37  ;;  %v4496_v38 = vpop.f32.mrb[70].mxu1 }
 0x32c   : > { %v2785_v39 = vadd.f32 %v4496_v38, %v5518_v16  ;;  %v2779_v40 = vpop.f32.mrb[71].mxu1 }
 0x32d   : > { %v2780_v41 = vadd.f32 %v5518_v16, %v2779_v40 }
 0x32e   : > { %3076 = vst.msk [vmem:[%s5522_s18 + $0x38] sm:$0xff] %vm3068_vm6, %v2785_v39 }
 0x32f   : > { %3075 = vst.msk [vmem:[%s5522_s18 + $0x30] sm:$0xff] %vm3068_vm6, %v2780_v41  ;;  %v4499_v42 = vpop.f32.mrb[72].mxu1 }
 0x330   : > { %v2795_v43 = vadd.f32 %v4499_v42, %v5518_v16  ;;  %v2789_v44 = vpop.f32.mrb[73].mxu1 }
 0x331   : > { %v2790_v45 = vadd.f32 %v5518_v16, %v2789_v44 }
 0x332   : > { %3078 = vst.msk [vmem:[%s5522_s18 + $0x48] sm:$0xff] %vm3068_vm6, %v2795_v43 }
 0x333   : > { %3077 = vst.msk [vmem:[%s5522_s18 + $0x40] sm:$0xff] %vm3068_vm6, %v2790_v45  ;;  %v4502_v46 = vpop.f32.mrb[74].mxu1 }
 0x334   : > { %v2805_v47 = vadd.f32 %v4502_v46, %v5518_v16  ;;  %v2799_v48 = vpop.f32.mrb[75].mxu1 }
 0x335   : > { %v2800_v49 = vadd.f32 %v5518_v16, %v2799_v48 }
 0x336   : > { %3080 = vst.msk [vmem:[%s5522_s18 + $0x58] sm:$0xff] %vm3068_vm6, %v2805_v47 }
 0x337   : > { %3079 = vst.msk [vmem:[%s5522_s18 + $0x50] sm:$0xff] %vm3068_vm6, %v2800_v49  ;;  %v4505_v50 = vpop.f32.mrb[76].mxu1 }
 0x338   : > { %v2815_v51 = vadd.f32 %v4505_v50, %v5518_v16  ;;  %v2809_v52 = vpop.f32.mrb[77].mxu1 }
 0x339   : > { %v2810_v53 = vadd.f32 %v5518_v16, %v2809_v52 }
 0x33a   : > { %3082 = vst.msk [vmem:[%s5522_s18 + $0x68] sm:$0xff] %vm3068_vm6, %v2815_v51 }
 0x33b   : > { %3081 = vst.msk [vmem:[%s5522_s18 + $0x60] sm:$0xff] %vm3068_vm6, %v2810_v53  ;;  %v4508_v54 = vpop.f32.mrb[78].mxu1 }
 0x33c   : > { %v2825_v55 = vadd.f32 %v4508_v54, %v5518_v16  ;;  %v2819_v56 = vpop.f32.mrb[79].mxu1 }
 0x33d   : > { %v2820_v57 = vadd.f32 %v5518_v16, %v2819_v56 }
 0x33e   : > { %3084 = vst.msk [vmem:[%s5522_s18 + $0x78] sm:$0xff] %vm3068_vm6, %v2825_v55 }
 0x33f   : > { %3083 = vst.msk [vmem:[%s5522_s18 + $0x70] sm:$0xff] %vm3068_vm6, %v2820_v57  ;;  %v4511_v58 = vpop.f32.mrb[80].mxu1 }
 0x340   : > { %v2835_v59 = vadd.f32 %v4511_v58, %v5518_v16  ;;  %v2829_v60 = vpop.f32.mrb[81].mxu1 }
 0x341   : > { %v2830_v61 = vadd.f32 %v5518_v16, %v2829_v60 }
 0x342   : > { %3086 = vst.msk [vmem:[%s5522_s18 + $0x88] sm:$0xff] %vm3068_vm6, %v2835_v59 }
 0x343   : > { %3085 = vst.msk [vmem:[%s5522_s18 + $0x80] sm:$0xff] %vm3068_vm6, %v2830_v61  ;;  %v4514_v62 = vpop.f32.mrb[82].mxu1 }
 0x344   : > { %v2845_v63 = vadd.f32 %v4514_v62, %v5518_v16  ;;  %v2839_v0 = vpop.f32.mrb[83].mxu1 }
 0x345   : > { %v2840_v1 = vadd.f32 %v5518_v16, %v2839_v0 }
 0x346   : > { %3088 = vst.msk [vmem:[%s5522_s18 + $0x98] sm:$0xff] %vm3068_vm6, %v2845_v63 }
 0x347   : > { %3087 = vst.msk [vmem:[%s5522_s18 + $0x90] sm:$0xff] %vm3068_vm6, %v2840_v1  ;;  %v4517_v2 = vpop.f32.mrb[84].mxu1 }
 0x348   : > { %v2855_v3 = vadd.f32 %v4517_v2, %v5518_v16  ;;  %v2849_v4 = vpop.f32.mrb[85].mxu1 }
 0x349   : > { %v2850_v5 = vadd.f32 %v5518_v16, %v2849_v4 }
 0x34a   : > { %3090 = vst.msk [vmem:[%s5522_s18 + $0xa8] sm:$0xff] %vm3068_vm6, %v2855_v3 }
 0x34b   : > { %3089 = vst.msk [vmem:[%s5522_s18 + $0xa0] sm:$0xff] %vm3068_vm6, %v2850_v5  ;;  %v4520_v6 = vpop.f32.mrb[86].mxu1 }
 0x34c   : > { %v2865_v7 = vadd.f32 %v4520_v6, %v5518_v16  ;;  %v2859_v8 = vpop.f32.mrb[87].mxu1 }
 0x34d   : > { %v2860_v9 = vadd.f32 %v5518_v16, %v2859_v8 }
 0x34e   : > { %3092 = vst.msk [vmem:[%s5522_s18 + $0xb8] sm:$0xff] %vm3068_vm6, %v2865_v7 }
 0x34f   : > { %3091 = vst.msk [vmem:[%s5522_s18 + $0xb0] sm:$0xff] %vm3068_vm6, %v2860_v9  ;;  %v4523_v10 = vpop.f32.mrb[88].mxu1 }
 0x350   : > { %v2875_v11 = vadd.f32 %v4523_v10, %v5518_v16  ;;  %v2869_v12 = vpop.f32.mrb[89].mxu1 }
 0x351   : > { %v2870_v13 = vadd.f32 %v5518_v16, %v2869_v12 }
 0x352   : > { %3094 = vst.msk [vmem:[%s5522_s18 + $0xc8] sm:$0xff] %vm3068_vm6, %v2875_v11 }
 0x353   : > { %3093 = vst.msk [vmem:[%s5522_s18 + $0xc0] sm:$0xff] %vm3068_vm6, %v2870_v13  ;;  %v4526_v14 = vpop.f32.mrb[90].mxu1 }
 0x354   : > { %v2885_v15 = vadd.f32 %v4526_v14, %v5518_v16  ;;  %v2879_v17 = vpop.f32.mrb[91].mxu1 }
 0x355   : > { %v2880_v18 = vadd.f32 %v5518_v16, %v2879_v17 }
 0x356   : > { %3096 = vst.msk [vmem:[%s5522_s18 + $0xd8] sm:$0xff] %vm3068_vm6, %v2885_v15 }
 0x357   : > { %3095 = vst.msk [vmem:[%s5522_s18 + $0xd0] sm:$0xff] %vm3068_vm6, %v2880_v18  ;;  %v4529_v19 = vpop.f32.mrb[92].mxu1 }
 0x358   : > { %v2895_v20 = vadd.f32 %v4529_v19, %v5518_v16  ;;  %v2889_v21 = vpop.f32.mrb[93].mxu1 }
 0x359   : > { %v2890_v22 = vadd.f32 %v5518_v16, %v2889_v21 }
 0x35a   : > { %3098 = vst.msk [vmem:[%s5522_s18 + $0xe8] sm:$0xff] %vm3068_vm6, %v2895_v20 }
 0x35b   : > { %3097 = vst.msk [vmem:[%s5522_s18 + $0xe0] sm:$0xff] %vm3068_vm6, %v2890_v22  ;;  %v4532_v24 = vpop.f32.mrb[94].mxu1 }
 0x35c   : > { %v2905_v25 = vadd.f32 %v4532_v24, %v5518_v16  ;;  %v2899_v26 = vpop.f32.mrb[95].mxu1 }
 0x35d   : > { %v2900_v27 = vadd.f32 %v5518_v16, %v2899_v26 }
 0x35e   : > { %3100 = vst.msk [vmem:[%s5522_s18 + $0xf8] sm:$0xff] %vm3068_vm6, %v2905_v25 }
 0x35f   : > { %3099 = vst.msk [vmem:[%s5522_s18 + $0xf0] sm:$0xff] %vm3068_vm6, %v2900_v27  ;;  %v4535_v23 = vpop.f32.mrb[96].mxu1 }
 0x360   : > { %v2915_v28 = vadd.f32 %v4535_v23, %v5518_v16  ;;  %v2909_v29 = vpop.f32.mrb[97].mxu1 }
 0x361   : > { %v2910_v30 = vadd.f32 %v5518_v16, %v2909_v29 }
 0x362   : > { %3102 = vst.msk [vmem:[%s5522_s18 + $0x108] sm:$0xff] %vm3068_vm6, %v2915_v28 }
 0x363   : > { %3101 = vst.msk [vmem:[%s5522_s18 + $0x100] sm:$0xff] %vm3068_vm6, %v2910_v30  ;;  %v4538_v31 = vpop.f32.mrb[98].mxu1 }
 0x364   : > { %v2925_v32 = vadd.f32 %v4538_v31, %v5518_v16  ;;  %v2919_v33 = vpop.f32.mrb[99].mxu1 }
 0x365   : > { %v2920_v34 = vadd.f32 %v5518_v16, %v2919_v33 }
 0x366   : > { %3104 = vst.msk [vmem:[%s5522_s18 + $0x118] sm:$0xff] %vm3068_vm6, %v2925_v32 }
 0x367   : > { %3103 = vst.msk [vmem:[%s5522_s18 + $0x110] sm:$0xff] %vm3068_vm6, %v2920_v34  ;;  %v4541_v35 = vpop.f32.mrb[100].mxu1 }
 0x368   : > { %v2935_v36 = vadd.f32 %v4541_v35, %v5518_v16  ;;  %v2929_v37 = vpop.f32.mrb[101].mxu1 }
 0x369   : > { %v2930_v38 = vadd.f32 %v5518_v16, %v2929_v37 }
 0x36a   : > { %3106 = vst.msk [vmem:[%s5522_s18 + $0x128] sm:$0xff] %vm3068_vm6, %v2935_v36 }
 0x36b   : > { %3105 = vst.msk [vmem:[%s5522_s18 + $0x120] sm:$0xff] %vm3068_vm6, %v2930_v38  ;;  %v4544_v39 = vpop.f32.mrb[102].mxu1 }
 0x36c   : > { %v2945_v40 = vadd.f32 %v4544_v39, %v5518_v16  ;;  %v2939_v41 = vpop.f32.mrb[103].mxu1 }
 0x36d   : > { %v2940_v42 = vadd.f32 %v5518_v16, %v2939_v41 }
 0x36e   : > { %3108 = vst.msk [vmem:[%s5522_s18 + $0x138] sm:$0xff] %vm3068_vm6, %v2945_v40 }
 0x36f   : > { %3107 = vst.msk [vmem:[%s5522_s18 + $0x130] sm:$0xff] %vm3068_vm6, %v2940_v42  ;;  %v4547_v43 = vpop.f32.mrb[104].mxu1 }
 0x370   : > { %v2955_v44 = vadd.f32 %v4547_v43, %v5518_v16  ;;  %v2949_v45 = vpop.f32.mrb[105].mxu1 }
 0x371   : > { %v2950_v46 = vadd.f32 %v5518_v16, %v2949_v45 }
 0x372   : > { %3110 = vst.msk [vmem:[%s5522_s18 + $0x148] sm:$0xff] %vm3068_vm6, %v2955_v44 }
 0x373   : > { %3109 = vst.msk [vmem:[%s5522_s18 + $0x140] sm:$0xff] %vm3068_vm6, %v2950_v46  ;;  %v4550_v47 = vpop.f32.mrb[106].mxu1 }
 0x374   : > { %v2965_v48 = vadd.f32 %v4550_v47, %v5518_v16  ;;  %v2959_v49 = vpop.f32.mrb[107].mxu1 }
 0x375   : > { %v2960_v50 = vadd.f32 %v5518_v16, %v2959_v49 }
 0x376   : > { %3112 = vst.msk [vmem:[%s5522_s18 + $0x158] sm:$0xff] %vm3068_vm6, %v2965_v48 }
 0x377   : > { %3111 = vst.msk [vmem:[%s5522_s18 + $0x150] sm:$0xff] %vm3068_vm6, %v2960_v50  ;;  %v4553_v51 = vpop.f32.mrb[108].mxu1 }
 0x378   : > { %v2975_v52 = vadd.f32 %v4553_v51, %v5518_v16  ;;  %v2969_v53 = vpop.f32.mrb[109].mxu1 }
 0x379   : > { %v2970_v54 = vadd.f32 %v5518_v16, %v2969_v53 }
 0x37a   : > { %3114 = vst.msk [vmem:[%s5522_s18 + $0x168] sm:$0xff] %vm3068_vm6, %v2975_v52 }
 0x37b   : > { %3113 = vst.msk [vmem:[%s5522_s18 + $0x160] sm:$0xff] %vm3068_vm6, %v2970_v54  ;;  %v4556_v55 = vpop.f32.mrb[110].mxu1 }
 0x37c   : > { %v2985_v56 = vadd.f32 %v4556_v55, %v5518_v16  ;;  %v2979_v57 = vpop.f32.mrb[111].mxu1 }
 0x37d   : > { %v2980_v58 = vadd.f32 %v5518_v16, %v2979_v57 }
 0x37e   : > { %3116 = vst.msk [vmem:[%s5522_s18 + $0x178] sm:$0xff] %vm3068_vm6, %v2985_v56 }
 0x37f   : > { %3115 = vst.msk [vmem:[%s5522_s18 + $0x170] sm:$0xff] %vm3068_vm6, %v2980_v58  ;;  %v4559_v59 = vpop.f32.mrb[112].mxu1 }
 0x380   : > { %v2995_v60 = vadd.f32 %v4559_v59, %v5518_v16  ;;  %v2989_v61 = vpop.f32.mrb[113].mxu1 }
 0x381   : > { %v2990_v62 = vadd.f32 %v5518_v16, %v2989_v61 }
 0x382   : > { %3118 = vst.msk [vmem:[%s5522_s18 + $0x188] sm:$0xff] %vm3068_vm6, %v2995_v60 }
 0x383   : > { %3117 = vst.msk [vmem:[%s5522_s18 + $0x180] sm:$0xff] %vm3068_vm6, %v2990_v62  ;;  %v4562_v63 = vpop.f32.mrb[114].mxu1 }
 0x384   : > { %v3005_v0 = vadd.f32 %v4562_v63, %v5518_v16  ;;  %v2999_v1 = vpop.f32.mrb[115].mxu1 }
 0x385   : > { %v3000_v2 = vadd.f32 %v5518_v16, %v2999_v1 }
 0x386   : > { %3120 = vst.msk [vmem:[%s5522_s18 + $0x198] sm:$0xff] %vm3068_vm6, %v3005_v0 }
 0x387   : > { %3119 = vst.msk [vmem:[%s5522_s18 + $0x190] sm:$0xff] %vm3068_vm6, %v3000_v2  ;;  %v4565_v3 = vpop.f32.mrb[116].mxu1 }
 0x388   : > { %v3015_v4 = vadd.f32 %v4565_v3, %v5518_v16  ;;  %v3009_v5 = vpop.f32.mrb[117].mxu1 }
 0x389   : > { %v3010_v6 = vadd.f32 %v5518_v16, %v3009_v5 }
 0x38a   : > { %3122 = vst.msk [vmem:[%s5522_s18 + $0x1a8] sm:$0xff] %vm3068_vm6, %v3015_v4 }
 0x38b   : > { %3121 = vst.msk [vmem:[%s5522_s18 + $0x1a0] sm:$0xff] %vm3068_vm6, %v3010_v6  ;;  %v4568_v7 = vpop.f32.mrb[118].mxu1 }
 0x38c   : > { %v3025_v8 = vadd.f32 %v4568_v7, %v5518_v16  ;;  %v3019_v9 = vpop.f32.mrb[119].mxu1 }
 0x38d   : > { %v3020_v10 = vadd.f32 %v5518_v16, %v3019_v9 }
 0x38e   : > { %3124 = vst.msk [vmem:[%s5522_s18 + $0x1b8] sm:$0xff] %vm3068_vm6, %v3025_v8 }
 0x38f   : > { %3123 = vst.msk [vmem:[%s5522_s18 + $0x1b0] sm:$0xff] %vm3068_vm6, %v3020_v10  ;;  %v4571_v11 = vpop.f32.mrb[120].mxu1 }
 0x390   : > { %v3035_v12 = vadd.f32 %v4571_v11, %v5518_v16  ;;  %v3029_v13 = vpop.f32.mrb[121].mxu1 }
 0x391   : > { %v3030_v14 = vadd.f32 %v5518_v16, %v3029_v13 }
 0x392   : > { %3126 = vst.msk [vmem:[%s5522_s18 + $0x1c8] sm:$0xff] %vm3068_vm6, %v3035_v12 }
 0x393   : > { %3125 = vst.msk [vmem:[%s5522_s18 + $0x1c0] sm:$0xff] %vm3068_vm6, %v3030_v14  ;;  %v4574_v15 = vpop.f32.mrb[122].mxu1 }
 0x394   : > { %v3045_v17 = vadd.f32 %v4574_v15, %v5518_v16  ;;  %v3039_v18 = vpop.f32.mrb[123].mxu1 }
 0x395   : > { %v3040_v19 = vadd.f32 %v5518_v16, %v3039_v18 }
 0x396   : > { %3128 = vst.msk [vmem:[%s5522_s18 + $0x1d8] sm:$0xff] %vm3068_vm6, %v3045_v17 }
 0x397   : > { %3127 = vst.msk [vmem:[%s5522_s18 + $0x1d0] sm:$0xff] %vm3068_vm6, %v3040_v19  ;;  %v4577_v20 = vpop.f32.mrb[124].mxu1 }
 0x398   : > { %v3055_v21 = vadd.f32 %v4577_v20, %v5518_v16  ;;  %v3049_v22 = vpop.f32.mrb[125].mxu1 }
 0x399   : > { %v3050_v24 = vadd.f32 %v5518_v16, %v3049_v22  ;;  %3139 = sbr.rel (!%p4924_p4) target bundleno = 1000 (0x3e8), region = 60 }
 0x39a   : > { %3130 = vst.msk [vmem:[%s5522_s18 + $0x1e8] sm:$0xff] %vm3068_vm6, %v3055_v21 }
 0x39b   : > { %3129 = vst.msk [vmem:[%s5522_s18 + $0x1e0] sm:$0xff] %vm3068_vm6, %v3050_v24  ;;  %v4580_v25 = vpop.f32.mrb[126].mxu1 }
 0x39c   : > { %v3065_v26 = vadd.f32 %v4580_v25, %v5518_v16  ;;  %v3059_v27 = vpop.f32.mrb[127].mxu1 }
 0x39d   : > { %v3060_v23 = vadd.f32 %v5518_v16, %v3059_v27 }
 0x39e   : > { %3132 = vst.msk [vmem:[%s5522_s18 + $0x1f8] sm:$0xff] %vm3068_vm6, %v3065_v26 }
 0x39f   : > { %3131 = vst.msk [vmem:[%s5522_s18 + $0x1f0] sm:$0xff] %vm3068_vm6, %v3060_v23 }
 0x3a0   : > { %s5940_s30 = smov (!%p3142_p8, %s3141_s30), 64 }
 0x3a1   : > { %s3884_s23 = sshll.u32 %s5940_s30, 7 }
 0x3a2   : > { %p3887_p9 = scmp.eq.s32.totalorder %s3884_s23, 0 }
 0x3a3   : > { %s5727_s25 = sshrl.u32 (!%p3887_p9), %s5940_s30, 6 }
 0x3a4   : > { %3150 = sbr.rel (%p3887_p9) target bundleno = 1000 (0x3e8), region = 64  ;;  %p3888_p10 = scmp.le.s32.totalorder (!%p3887_p9), %s5727_s25, 0 }
 0x3ab   : > { %3562 = sbr.rel (%p3888_p10) target bundleno = 979 (0x3d3), region = 143  ;;  %s5931_s12 = smov (!%p3888_p10), %s5721_s21 }
 0x3ac   : > { %s5932_s17 = smov (!%p3888_p10), %s5522_s18  ;;  %s5736_s24 = smov (!%p3888_p10), 0  }
 0x3ad   : > { %s5738_s26 = smov (!%p3888_p10), 0  }
 0x3b2 LB: >> { %v3338_v16 = vld [vmem:[%s4822_s17] sm:$0xff]  ;;  %v3340_v28 = vld [vmem:[%s4822_s17 + $0x8] sm:$0xff]  ;;  %v3342_v29 = vld [vmem:[%s4822_s17 + $0x10] sm:$0xff]  ;;  %s3466_s27 = sadd.s32 1, %s4826_s24  ;;  %s3332_s26 = sadd.s32 1, %s4830_s26   ;;  %s4830_s26 = sphi %s5738_s26, %s3332_s26   ;;  %s4826_s24 = sphi %s5736_s24, %s5935_s24   ;;  %s4822_s17 = sphi %s5932_s17, %s5934_s17   ;;  %s4818_s12 = sphi %s5931_s12, %s5933_s12  }
 0x3b3   : >> { %3339 = vst [vmem:[%s4818_s12] sm:$0xff] %v3338_v16  ;;  %3341 = vst [vmem:[%s4818_s12 + $0x8] sm:$0xff] %v3340_v28  ;;  %v3344_v30 = vld [vmem:[%s4822_s17 + $0x18] sm:$0xff]  ;;  %v3346_v31 = vld [vmem:[%s4822_s17 + $0x20] sm:$0xff]  ;;  %p3467_p11 = scmp.ge.s32.totalorder %s3466_s27, %s5727_s25  ;;  %p3331_p12 = scmp.ge.s32.totalorder %s3332_s26, %s5727_s25 }
 0x3b4   : >> { %3343 = vst [vmem:[%s4818_s12 + $0x10] sm:$0xff] %v3342_v29  ;;  %v3348_v32 = vld [vmem:[%s4822_s17 + $0x28] sm:$0xff]  ;;  %3345 = vst [vmem:[%s4818_s12 + $0x18] sm:$0xff] %v3344_v30  ;;  %v3350_v33 = vld [vmem:[%s4822_s17 + $0x30] sm:$0xff] }
 0x3b5   : >> { %3347 = vst [vmem:[%s4818_s12 + $0x20] sm:$0xff] %v3346_v31  ;;  %3349 = vst [vmem:[%s4818_s12 + $0x28] sm:$0xff] %v3348_v32  ;;  %v3352_v34 = vld [vmem:[%s4822_s17 + $0x38] sm:$0xff]  ;;  %v3354_v35 = vld [vmem:[%s4822_s17 + $0x40] sm:$0xff]  ;;  %s5942_s27 = smov (%p3467_p11, %s3466_s27), 0 }
 0x3b6   : >> { %3351 = vst [vmem:[%s4818_s12 + $0x30] sm:$0xff] %v3350_v33  ;;  %3353 = vst [vmem:[%s4818_s12 + $0x38] sm:$0xff] %v3352_v34  ;;  %v3356_v36 = vld [vmem:[%s4822_s17 + $0x48] sm:$0xff]  ;;  %v3358_v37 = vld [vmem:[%s4822_s17 + $0x50] sm:$0xff]  ;;  %s3889_s28 = sshll.u32 %s5942_s27, 9  ;;  %s5935_s24 = smov %s5942_s27 }
 0x3b7   : >> { %3355 = vst [vmem:[%s4818_s12 + $0x40] sm:$0xff] %v3354_v35  ;;  %v3360_v38 = vld [vmem:[%s4822_s17 + $0x58] sm:$0xff]  ;;  %3357 = vst [vmem:[%s4818_s12 + $0x48] sm:$0xff] %v3356_v36  ;;  %v3362_v39 = vld [vmem:[%s4822_s17 + $0x60] sm:$0xff]  ;;  %s5794_s29 = scalar_lea.vmem %s5522_s18, %s3889_s28 [#allocation2]   ;;  %s5797_s11 = scalar_lea.vmem %s5721_s21, %s3889_s28  }
 0x3b8   : >> { %3359 = vst [vmem:[%s4818_s12 + $0x50] sm:$0xff] %v3358_v37  ;;  %3361 = vst [vmem:[%s4818_s12 + $0x58] sm:$0xff] %v3360_v38  ;;  %v3364_v40 = vld [vmem:[%s4822_s17 + $0x68] sm:$0xff]  ;;  %v3366_v41 = vld [vmem:[%s4822_s17 + $0x70] sm:$0xff] }
 0x3b9   : >> { %3363 = vst [vmem:[%s4818_s12 + $0x60] sm:$0xff] %v3362_v39  ;;  %3365 = vst [vmem:[%s4818_s12 + $0x68] sm:$0xff] %v3364_v40  ;;  %v3368_v42 = vld [vmem:[%s4822_s17 + $0x78] sm:$0xff]  ;;  %v3370_v43 = vld [vmem:[%s4822_s17 + $0x80] sm:$0xff] }
 0x3ba   : >> { %3367 = vst [vmem:[%s4818_s12 + $0x70] sm:$0xff] %v3366_v41  ;;  %v3372_v44 = vld [vmem:[%s4822_s17 + $0x88] sm:$0xff]  ;;  %3369 = vst [vmem:[%s4818_s12 + $0x78] sm:$0xff] %v3368_v42  ;;  %v3374_v45 = vld [vmem:[%s4822_s17 + $0x90] sm:$0xff] }
 0x3bb   : >> { %3371 = vst [vmem:[%s4818_s12 + $0x80] sm:$0xff] %v3370_v43  ;;  %3373 = vst [vmem:[%s4818_s12 + $0x88] sm:$0xff] %v3372_v44  ;;  %v3376_v46 = vld [vmem:[%s4822_s17 + $0x98] sm:$0xff]  ;;  %v3378_v47 = vld [vmem:[%s4822_s17 + $0xa0] sm:$0xff] }
 0x3bc   : >> { %3375 = vst [vmem:[%s4818_s12 + $0x90] sm:$0xff] %v3374_v45  ;;  %3377 = vst [vmem:[%s4818_s12 + $0x98] sm:$0xff] %v3376_v46  ;;  %v3380_v48 = vld [vmem:[%s4822_s17 + $0xa8] sm:$0xff]  ;;  %v3382_v49 = vld [vmem:[%s4822_s17 + $0xb0] sm:$0xff] }
 0x3bd   : >> { %3379 = vst [vmem:[%s4818_s12 + $0xa0] sm:$0xff] %v3378_v47  ;;  %v3384_v50 = vld [vmem:[%s4822_s17 + $0xb8] sm:$0xff]  ;;  %3381 = vst [vmem:[%s4818_s12 + $0xa8] sm:$0xff] %v3380_v48  ;;  %v3386_v51 = vld [vmem:[%s4822_s17 + $0xc0] sm:$0xff] }
 0x3be   : >> { %3383 = vst [vmem:[%s4818_s12 + $0xb0] sm:$0xff] %v3382_v49  ;;  %3385 = vst [vmem:[%s4818_s12 + $0xb8] sm:$0xff] %v3384_v50  ;;  %v3388_v52 = vld [vmem:[%s4822_s17 + $0xc8] sm:$0xff]  ;;  %v3390_v53 = vld [vmem:[%s4822_s17 + $0xd0] sm:$0xff] }
 0x3bf   : >> { %3387 = vst [vmem:[%s4818_s12 + $0xc0] sm:$0xff] %v3386_v51  ;;  %3389 = vst [vmem:[%s4818_s12 + $0xc8] sm:$0xff] %v3388_v52  ;;  %v3392_v54 = vld [vmem:[%s4822_s17 + $0xd8] sm:$0xff]  ;;  %v3394_v55 = vld [vmem:[%s4822_s17 + $0xe0] sm:$0xff] }
 0x3c0   : >> { %3391 = vst [vmem:[%s4818_s12 + $0xd0] sm:$0xff] %v3390_v53  ;;  %v3396_v56 = vld [vmem:[%s4822_s17 + $0xe8] sm:$0xff]  ;;  %3393 = vst [vmem:[%s4818_s12 + $0xd8] sm:$0xff] %v3392_v54  ;;  %v3398_v57 = vld [vmem:[%s4822_s17 + $0xf0] sm:$0xff] }
 0x3c1   : >> { %3395 = vst [vmem:[%s4818_s12 + $0xe0] sm:$0xff] %v3394_v55  ;;  %3397 = vst [vmem:[%s4818_s12 + $0xe8] sm:$0xff] %v3396_v56  ;;  %v3400_v58 = vld [vmem:[%s4822_s17 + $0xf8] sm:$0xff]  ;;  %v3402_v59 = vld [vmem:[%s4822_s17 + $0x100] sm:$0xff] }
 0x3c2   : >> { %3399 = vst [vmem:[%s4818_s12 + $0xf0] sm:$0xff] %v3398_v57  ;;  %3401 = vst [vmem:[%s4818_s12 + $0xf8] sm:$0xff] %v3400_v58  ;;  %v3404_v60 = vld [vmem:[%s4822_s17 + $0x108] sm:$0xff]  ;;  %v3406_v61 = vld [vmem:[%s4822_s17 + $0x110] sm:$0xff] }
 0x3c3   : >> { %3403 = vst [vmem:[%s4818_s12 + $0x100] sm:$0xff] %v3402_v59  ;;  %v3408_v62 = vld [vmem:[%s4822_s17 + $0x118] sm:$0xff]  ;;  %3405 = vst [vmem:[%s4818_s12 + $0x108] sm:$0xff] %v3404_v60  ;;  %v3410_v63 = vld [vmem:[%s4822_s17 + $0x120] sm:$0xff] }
 0x3c4   : >> { %3407 = vst [vmem:[%s4818_s12 + $0x110] sm:$0xff] %v3406_v61  ;;  %3409 = vst [vmem:[%s4818_s12 + $0x118] sm:$0xff] %v3408_v62  ;;  %v3412_v0 = vld [vmem:[%s4822_s17 + $0x128] sm:$0xff]  ;;  %v3414_v1 = vld [vmem:[%s4822_s17 + $0x130] sm:$0xff] }
 0x3c5   : >> { %3411 = vst [vmem:[%s4818_s12 + $0x120] sm:$0xff] %v3410_v63  ;;  %3413 = vst [vmem:[%s4818_s12 + $0x128] sm:$0xff] %v3412_v0  ;;  %v3416_v2 = vld [vmem:[%s4822_s17 + $0x138] sm:$0xff]  ;;  %v3418_v3 = vld [vmem:[%s4822_s17 + $0x140] sm:$0xff] }
 0x3c6   : >> { %3415 = vst [vmem:[%s4818_s12 + $0x130] sm:$0xff] %v3414_v1  ;;  %v3420_v4 = vld [vmem:[%s4822_s17 + $0x148] sm:$0xff]  ;;  %3417 = vst [vmem:[%s4818_s12 + $0x138] sm:$0xff] %v3416_v2  ;;  %v3422_v5 = vld [vmem:[%s4822_s17 + $0x150] sm:$0xff] }
 0x3c7   : >> { %3419 = vst [vmem:[%s4818_s12 + $0x140] sm:$0xff] %v3418_v3  ;;  %3421 = vst [vmem:[%s4818_s12 + $0x148] sm:$0xff] %v3420_v4  ;;  %v3424_v6 = vld [vmem:[%s4822_s17 + $0x158] sm:$0xff]  ;;  %v3426_v7 = vld [vmem:[%s4822_s17 + $0x160] sm:$0xff] }
 0x3c8   : >> { %3423 = vst [vmem:[%s4818_s12 + $0x150] sm:$0xff] %v3422_v5  ;;  %3425 = vst [vmem:[%s4818_s12 + $0x158] sm:$0xff] %v3424_v6  ;;  %v3428_v8 = vld [vmem:[%s4822_s17 + $0x168] sm:$0xff]  ;;  %v3430_v9 = vld [vmem:[%s4822_s17 + $0x170] sm:$0xff] }
 0x3c9   : >> { %3427 = vst [vmem:[%s4818_s12 + $0x160] sm:$0xff] %v3426_v7  ;;  %v3432_v10 = vld [vmem:[%s4822_s17 + $0x178] sm:$0xff]  ;;  %3429 = vst [vmem:[%s4818_s12 + $0x168] sm:$0xff] %v3428_v8  ;;  %v3434_v11 = vld [vmem:[%s4822_s17 + $0x180] sm:$0xff] }
 0x3ca   : >> { %3431 = vst [vmem:[%s4818_s12 + $0x170] sm:$0xff] %v3430_v9  ;;  %3433 = vst [vmem:[%s4818_s12 + $0x178] sm:$0xff] %v3432_v10  ;;  %v3436_v12 = vld [vmem:[%s4822_s17 + $0x188] sm:$0xff]  ;;  %v3438_v13 = vld [vmem:[%s4822_s17 + $0x190] sm:$0xff] }
 0x3cb   : >> { %3435 = vst [vmem:[%s4818_s12 + $0x180] sm:$0xff] %v3434_v11  ;;  %3437 = vst [vmem:[%s4818_s12 + $0x188] sm:$0xff] %v3436_v12  ;;  %v3440_v14 = vld [vmem:[%s4822_s17 + $0x198] sm:$0xff]  ;;  %v3442_v15 = vld [vmem:[%s4822_s17 + $0x1a0] sm:$0xff] }
 0x3cc   : >> { %3439 = vst [vmem:[%s4818_s12 + $0x190] sm:$0xff] %v3438_v13  ;;  %v3444_v17 = vld [vmem:[%s4822_s17 + $0x1a8] sm:$0xff]  ;;  %3441 = vst [vmem:[%s4818_s12 + $0x198] sm:$0xff] %v3440_v14  ;;  %v3446_v18 = vld [vmem:[%s4822_s17 + $0x1b0] sm:$0xff]  ;;  %3334 = sbr.rel (!%p3331_p12) target bundleno = 946 (0x3b2), region = 149 }
 0x3cd   : >> { %3443 = vst [vmem:[%s4818_s12 + $0x1a0] sm:$0xff] %v3442_v15  ;;  %3445 = vst [vmem:[%s4818_s12 + $0x1a8] sm:$0xff] %v3444_v17  ;;  %v3448_v19 = vld [vmem:[%s4822_s17 + $0x1b8] sm:$0xff]  ;;  %v3450_v20 = vld [vmem:[%s4822_s17 + $0x1c0] sm:$0xff] }
 0x3ce   : >> { %3447 = vst [vmem:[%s4818_s12 + $0x1b0] sm:$0xff] %v3446_v18  ;;  %3449 = vst [vmem:[%s4818_s12 + $0x1b8] sm:$0xff] %v3448_v19  ;;  %v3452_v21 = vld [vmem:[%s4822_s17 + $0x1c8] sm:$0xff]  ;;  %v3454_v22 = vld [vmem:[%s4822_s17 + $0x1d0] sm:$0xff] }
 0x3cf   : >> { %3451 = vst [vmem:[%s4818_s12 + $0x1c0] sm:$0xff] %v3450_v20  ;;  %v3456_v24 = vld [vmem:[%s4822_s17 + $0x1d8] sm:$0xff]  ;;  %3453 = vst [vmem:[%s4818_s12 + $0x1c8] sm:$0xff] %v3452_v21  ;;  %v3458_v25 = vld [vmem:[%s4822_s17 + $0x1e0] sm:$0xff] }
 0x3d0   : >> { %3455 = vst [vmem:[%s4818_s12 + $0x1d0] sm:$0xff] %v3454_v22  ;;  %3457 = vst [vmem:[%s4818_s12 + $0x1d8] sm:$0xff] %v3456_v24  ;;  %v3460_v26 = vld [vmem:[%s4822_s17 + $0x1e8] sm:$0xff]  ;;  %v3462_v27 = vld [vmem:[%s4822_s17 + $0x1f0] sm:$0xff] }
 0x3d1   : >> { %3459 = vst [vmem:[%s4818_s12 + $0x1e0] sm:$0xff] %v3458_v25  ;;  %3461 = vst [vmem:[%s4818_s12 + $0x1e8] sm:$0xff] %v3460_v26  ;;  %v3464_v23 = vld [vmem:[%s4822_s17 + $0x1f8] sm:$0xff]  ;;  %s5934_s17 = smov %s5794_s29 }
 0x3d2   : >> { %3463 = vst [vmem:[%s4818_s12 + $0x1f0] sm:$0xff] %v3462_v27  ;;  %3465 = vst [vmem:[%s4818_s12 + $0x1f8] sm:$0xff] %v3464_v23  ;;  %s5933_s12 = smov %s5797_s11 }
 0x3d3 PF: > { %s5902_s14 = sand.u32 63, %s5940_s30   ;;  %s3900_s15 = sshll.u32 %s5727_s25, 9 }
 0x3d4   : > { %s3477_s19 = scalar_lea.vmem %s5522_s18, %s3900_s15 [#allocation2]   ;;  %s3479_s20 = scalar_lea.vmem %s5721_s21, %s3900_s15  }
 0x3d5   : > { %p3894_p13 = scmp.le.s32.totalorder %s5902_s14, 0 }
 0x3d6   : > { %s4832_s22 = smov (!%p3894_p13), %s3479_s20   ;;  %s4836_s23 = smov (!%p3894_p13), %s3477_s19  }
 0x3d7   : > { %3576 = sbr.rel (%p3894_p13) target bundleno = 1000 (0x3e8), region = 154  ;;  %s4840_s28 = smov (!%p3894_p13), 0  }
 0x3d8   : > { %s4844_s27 = smov (!%p3894_p13), 0  }
 0x3de LB: >> { %v3489_v16 = vld [vmem:[%s4838_s23] sm:$0xff]  ;;  %s3491_s30 = sadd.s32 1, %s4842_s28  ;;  %s3483_s27 = sadd.s32 1, %s4846_s27   ;;  %s4846_s27 = sphi %s4844_s27, %s3483_s27   ;;  %s4842_s28 = sphi %s4840_s28, %s4841_s28   ;;  %s4838_s23 = sphi %s4836_s23, %s3496_s23   ;;  %s4834_s22 = sphi %s4832_s22, %s3497_s22  }
 0x3df   : >> { %3490 = vst [vmem:[%s4834_s22] sm:$0xff] %v3489_v16  ;;  %p3492_p0 = scmp.ge.s32.totalorder %s3491_s30, %s5902_s14  ;;  %p3482_p1 = scmp.ge.s32.totalorder %s3483_s27, %s5902_s14 }
 0x3e1   : >> { %s5944_s30 = smov (%p3492_p0, %s3491_s30), 0  ;;  %3485 = sbr.rel (!%p3482_p1) target bundleno = 990 (0x3de), region = 160 }
 0x3e2   : >> { %s3895_s18 = sshll.u32 %s5944_s30, 3  ;;  %s4841_s28 = smov %s5944_s30  }
 0x3e3   : >> { %s3496_s23 = scalar_lea.vmem %s3477_s19, %s3895_s18 [#allocation2]   ;;  %s3497_s22 = scalar_lea.vmem %s3479_s20, %s3895_s18  }
 0x3e8 PF: > { %p16_p2 = scmp.ge.s32.totalorder %s4914_s13, 4   ;;  %s5936_s30 = smov %s4810_s10 }
 0x3e9   : > { %s5937_s10 = smov %s4922_s16  ;;  %s5938_s11 = smov %s4914_s13 }
 0x3ea   :  { %18 = sbr.rel (!%p16_p2) target bundleno = 2 (0x2), region = 171 }

</bundles_post_ra>
